<compile_context>
chip_gen: v6e
topology: v6e:2x2x1
jax: 0.10.0
libtpu: 0.0.40
codegen_flags: <defaults>
</compile_context>

<pallas_src>
import functools
import math

import jax
import jax.numpy as jnp
import numpy as np
from jax import lax
from jax.experimental import pallas as pl
from jax.experimental.pallas import tpu as pltpu


def _round_up(a, b):
    return -(-a // b) * b


def _cdiv(a, b):
    return -(-a // b)


def _gelu_exact(x):
    # PyTorch nn.GELU() default = exact erf-based GELU (used only by the reference).
    return 0.5 * x * (1.0 + lax.erf(x * (1.0 / math.sqrt(2.0))))


# ----------------------------------------------------------------------------------
# Kernel
# ----------------------------------------------------------------------------------
def _ffn_kernel(x_ref, g_ref, be_ref,
                w1_ref, b1_ref, w2_ref, b2_ref, w3_ref, b3_ref,
                o_ref, *, inv_d, act_bf16):
    x = x_ref[...].astype(jnp.float32)

    # --- LayerNorm, single-pass statistics (eps = 1e-5, PyTorch default), f32 ------
    s1 = jnp.sum(x, axis=-1, keepdims=True)
    s2 = jnp.sum(x * x, axis=-1, keepdims=True)
    mean = s1 * inv_d
    var = jnp.maximum(s2 * inv_d - mean * mean, 0.0)
    xn = (x - mean) * lax.rsqrt(var + 1e-5)
    xn = xn * g_ref[...] + be_ref[...]

    act_dt = jnp.bfloat16 if act_bf16 else jnp.float32

    # --- Linear(input_dim, embed_dim) + GELU (MXU bf16 in / f32 acc, EUP tanh) -----
    h1 = jnp.dot(xn.astype(jnp.bfloat16), w1_ref[...],
                 preferred_element_type=jnp.float32) + b1_ref[...]
    h1 = jax.nn.gelu(h1.astype(act_dt), approximate=True).astype(jnp.bfloat16)

    # --- Linear(embed_dim, embed_dim) + GELU ----------------------------------------
    h2 = jnp.dot(h1, w2_ref[...], preferred_element_type=jnp.float32) + b2_ref[...]
    h2 = jax.nn.gelu(h2.astype(act_dt), approximate=True).astype(jnp.bfloat16)

    # --- Linear(embed_dim, n_classes) ------------------------------------------------
    out = jnp.dot(h2, w3_ref[...], preferred_element_type=jnp.float32) + b3_ref[...]
    o_ref[...] = out.astype(o_ref.dtype)


# ----------------------------------------------------------------------------------
# Generation detection
# ----------------------------------------------------------------------------------
def _tpu_caps():
    """Returns (physical VMEM bytes per core, VPU/EUP has packed bf16 path)."""
    kind = ""
    try:
        kind = jax.devices()[0].device_kind.lower()
    except Exception:
        pass
    bf16_vpu = "v5" not in kind        # v5e has no bf16 VPU/EUP path
    vmem_bytes = None
    try:
        vmem_bytes = int(pltpu.get_tpu_info().vmem_capacity_bytes)
    except Exception:
        vmem_bytes = None
    if not vmem_bytes:
        vmem_bytes = (64 << 20) if "v7" in kind else (128 << 20)
    return vmem_bytes, bf16_vpu


# ----------------------------------------------------------------------------------
# Parameter preparation (done ONCE, not per forward call)
# ----------------------------------------------------------------------------------
def prepare_params(params):
    """Pad embed_dim / n_classes to lane-dense multiples of 128 and pre-cast weights
    to bf16.  Padding is exact: GELU(0)=0 and padded weight rows/cols/biases are 0."""
    gamma, beta, w1, b1, w2, b2, w3, b3 = params
    input_dim, embed_dim = w1.shape
    n_classes = w3.shape[1]

    ep = max(_round_up(embed_dim, 128), 128)
    cp = max(_round_up(n_classes, 128), 128)

    w1p = jnp.zeros((input_dim, ep), jnp.bfloat16).at[:, :embed_dim].set(
        w1.astype(jnp.bfloat16))
    w2p = jnp.zeros((ep, ep), jnp.bfloat16).at[:embed_dim, :embed_dim].set(
        w2.astype(jnp.bfloat16))
    w3p = jnp.zeros((ep, cp), jnp.bfloat16).at[:embed_dim, :n_classes].set(
        w3.astype(jnp.bfloat16))
    b1p = jnp.zeros((1, ep), jnp.float32).at[0, :embed_dim].set(b1.astype(jnp.float32))
    b2p = jnp.zeros((1, ep), jnp.float32).at[0, :embed_dim].set(b2.astype(jnp.float32))
    b3p = jnp.zeros((1, cp), jnp.float32).at[0, :n_classes].set(b3.astype(jnp.float32))
    g2 = gamma.reshape(1, input_dim).astype(jnp.float32)
    be2 = beta.reshape(1, input_dim).astype(jnp.float32)

    return dict(g=g2, be=be2, w1=w1p, b1=b1p, w2=w2p, b2=b2p, w3=w3p, b3=b3p,
                input_dim=input_dim, embed_dim=embed_dim, n_classes=n_classes,
                ep=ep, cp=cp)


# ----------------------------------------------------------------------------------
# Forward wrapper
# ----------------------------------------------------------------------------------
def classifier_feedforward(x, prep, *, tm=None):
    """x: (..., input_dim); prep: output of prepare_params.  Returns (..., n_classes)."""
    input_dim = prep["input_dim"]
    n_classes = prep["n_classes"]
    ep, cp = prep["ep"], prep["cp"]

    lead = x.shape[:-1]
    n = int(np.prod(lead)) if lead else 1
    x2 = x.reshape(n, input_dim)

    vmem_bytes, bf16_vpu = _tpu_caps()
    act_bf16 = bf16_vpu
    big_vmem = vmem_bytes >= (96 << 20)

    # Requested scoped-VMEM cap per generation (leave headroom for Mosaic scratch).
    vmem_request_cap = (100 << 20) if big_vmem else (56 << 20)

    use_single_buffer = hasattr(pl, "Buffered")
    n_wbuf = 1 if use_single_buffer else 2

    w_bytes = (prep["w1"].size + prep["w2"].size + prep["w3"].size) * 2   # bf16
    b_bytes = (prep["g"].size + prep["be"].size
               + prep["b1"].size + prep["b2"].size + prep["b3"].size) * 4
    x_itemsize = jnp.dtype(x.dtype).itemsize

    def est(tm_):
        act = 2 if act_bf16 else 4
        return ((tm_ * input_dim * x_itemsize * 2)             # double-buffered x tile
                + (tm_ * cp * x_itemsize * 2)                  # double-buffered out tile
                + (w_bytes + b_bytes) * n_wbuf                 # resident params
                + tm_ * (input_dim * 6                         # x f32 copy + xn bf16
                         + ep * (4 + act) * 2                  # dot outs + h1/h2
                         + cp * 4))                            # final f32 out

    # --- row tile: aim for >= ~8 grid steps so the pipeline / both v7x TCs have work
    if tm is None:
        tm_cap = 1024 if big_vmem else 512
        tm = min(tm_cap, _round_up(max(_cdiv(n, 8), 1), 8))
    tm = max(8, _round_up(min(tm, _round_up(n, 8)), 8))

    headroom = 8 << 20
    while tm > 8 and est(tm) + headroom > vmem_request_cap:
        tm = max(8, _round_up(tm // 2, 8))
    # TODO(synk): if est(8) still exceeds the cap (huge embed_dim on v7x), tile the ep
    # columns of W1/W2 across an extra grid axis instead of keeping all weights resident.
    vmem_limit = int(min(max(est(tm) + headroom, 16 << 20), vmem_request_cap))

    n_pad = _round_up(n, tm)
    if n_pad != n:
        x2 = jnp.pad(x2, ((0, n_pad - n), (0, 0)))   # zero rows: LN/GELU safe, discarded
    grid = (n_pad // tm,)

    def row_map(i):
        return (i, 0)

    def fixed_map(i):
        return (0, 0)

    kernel = functools.partial(_ffn_kernel, inv_d=1.0 / float(input_dim),
                               act_bf16=act_bf16)
    args = (x2, prep["g"], prep["be"], prep["w1"], prep["b1"],
            prep["w2"], prep["b2"], prep["w3"], prep["b3"])

    def run(single_buffer_weights):
        wkw = dict(pipeline_mode=pl.Buffered(1)) if single_buffer_weights else {}
        in_specs = [
            pl.BlockSpec((tm, input_dim), row_map),              # x rows (pipelined)
            pl.BlockSpec((1, input_dim), fixed_map, **wkw),      # gamma
            pl.BlockSpec((1, input_dim), fixed_map, **wkw),      # beta
            pl.BlockSpec((input_dim, ep), fixed_map, **wkw),     # W1
            pl.BlockSpec((1, ep), fixed_map, **wkw),             # b1
            pl.BlockSpec((ep, ep), fixed_map, **wkw),            # W2
            pl.BlockSpec((1, ep), fixed_map, **wkw),             # b2
            pl.BlockSpec((ep, cp), fixed_map, **wkw),            # W3
            pl.BlockSpec((1, cp), fixed_map, **wkw),             # b3
        ]
        return pl.pallas_call(
            kernel,
            out_shape=jax.ShapeDtypeStruct((n_pad, cp), x.dtype),
            grid_spec=pltpu.PrefetchScalarGridSpec(
                num_scalar_prefetch=0,
                grid=grid,
                in_specs=in_specs,
                out_specs=pl.BlockSpec((tm, cp), row_map),       # lane-dense output
            ),
            compiler_params=pltpu.CompilerParams(
                dimension_semantics=("parallel",),
                vmem_limit_bytes=vmem_limit,
            ),
        )(*args)

    if use_single_buffer:
        try:
            out2 = run(True)
        except Exception:
            # pl.Buffered exists but Buffered(1) rejected by this Mosaic build
            # (eager pallas_call: compile errors surface here, so this is reachable).
            out2 = run(False)
    else:
        out2 = run(False)

    return out2[:n, :n_classes].reshape(*lead, n_classes)


# ----------------------------------------------------------------------------------
# Synthetic params + pure-JAX reference
# ----------------------------------------------------------------------------------
def init_params(key, input_dim, embed_dim, n_classes, dtype=jnp.float32):
    """Deterministic synthetic parameters (shapes match the PyTorch module)."""
    ks = jax.random.split(key, 6)
    gamma = jnp.ones((input_dim,), dtype)                     # LayerNorm weight
    beta = jnp.zeros((input_dim,), dtype)                     # LayerNorm bias
    # Linear weights stored already transposed: (in, out), so y = x @ W + b.
    w1 = (jax.random.normal(ks[0], (input_dim, embed_dim), dtype)
          / math.sqrt(input_dim))
    b1 = jax.random.normal(ks[1], (embed_dim,), dtype) * 0.01
    w2 = (jax.random.normal(ks[2], (embed_dim, embed_dim), dtype)
          / math.sqrt(embed_dim))
    b2 = jax.random.normal(ks[3], (embed_dim,), dtype) * 0.01
    w3 = (jax.random.normal(ks[4], (embed_dim, n_classes), dtype)
          / math.sqrt(embed_dim))
    b3 = jax.random.normal(ks[5], (n_classes,), dtype) * 0.01
    return (gamma, beta, w1, b1, w2, b2, w3, b3)


def reference(x, params):
    """Pure-JAX f32 reference matching the PyTorch forward (exact erf GELU)."""
    gamma, beta, w1, b1, w2, b2, w3, b3 = params
    mean = jnp.mean(x, axis=-1, keepdims=True)
    var = jnp.mean((x - mean) ** 2, axis=-1, keepdims=True)
    xn = (x - mean) / jnp.sqrt(var + 1e-5) * gamma + beta
    h = _gelu_exact(xn @ w1 + b1)
    h = _gelu_exact(h @ w2 + b2)
    return h @ w3 + b3


if __name__ == "__main__":
    key = jax.random.PRNGKey(0)
    k_x, k_p = jax.random.split(key)

    batch, seq = 2, 8
    input_dim, embed_dim, n_classes = 32, 64, 8

    x = jax.random.normal(k_x, (batch, seq, input_dim), jnp.float32)
    params = init_params(k_p, input_dim, embed_dim, n_classes)
    prep = prepare_params(params)          # padding / bf16 cast done once

    out = classifier_feedforward(x, prep)
    out = jax.block_until_ready(out)

    ref = reference(x, params)
    assert out.shape == (batch, seq, n_classes)
    # bf16 matmuls (f32 acc) + tanh-approx GELU => ~1e-2-level deviation from f32/erf ref.
    assert np.allclose(np.asarray(out), np.asarray(ref), atol=5e-2, rtol=5e-2)

    print("KERNEL_OK")
</pallas_src>

<mosaic_0001>
module attributes {stable_mosaic.version = 11 : i64} {
  func.func @_ffn_kernel(%arg0: i32, %arg1: memref<8x32xf32, #tpu.memory_space<vmem>>, %arg2: memref<1x32xf32, #tpu.memory_space<vmem>>, %arg3: memref<1x32xf32, #tpu.memory_space<vmem>>, %arg4: memref<32x128xbf16, #tpu.memory_space<vmem>>, %arg5: memref<1x128xf32, #tpu.memory_space<vmem>>, %arg6: memref<128x128xbf16, #tpu.memory_space<vmem>>, %arg7: memref<1x128xf32, #tpu.memory_space<vmem>>, %arg8: memref<128x128xbf16, #tpu.memory_space<vmem>>, %arg9: memref<1x128xf32, #tpu.memory_space<vmem>>, %arg10: memref<8x128xf32, #tpu.memory_space<vmem>>) attributes {dimension_semantics = [#tpu.dimension_semantics<parallel>], iteration_bounds = array<i64: 2>, scalar_prefetch = 0 : i64, scratch_operands = 0 : i64, tpu.core_type = #tpu.core_type<tc>, window_params = [{transform_indices = @transform_0, window_bounds = array<i64: 8, 32>}, {pipeline_mode = #tpu.pipeline_mode<synchronous>, transform_indices = @transform_1, window_bounds = array<i64: 1, 32>}, {pipeline_mode = #tpu.pipeline_mode<synchronous>, transform_indices = @transform_2, window_bounds = array<i64: 1, 32>}, {pipeline_mode = #tpu.pipeline_mode<synchronous>, transform_indices = @transform_3, window_bounds = array<i64: 32, 128>}, {pipeline_mode = #tpu.pipeline_mode<synchronous>, transform_indices = @transform_4, window_bounds = array<i64: 1, 128>}, {pipeline_mode = #tpu.pipeline_mode<synchronous>, transform_indices = @transform_5, window_bounds = array<i64: 128, 128>}, {pipeline_mode = #tpu.pipeline_mode<synchronous>, transform_indices = @transform_6, window_bounds = array<i64: 1, 128>}, {pipeline_mode = #tpu.pipeline_mode<synchronous>, transform_indices = @transform_7, window_bounds = array<i64: 128, 128>}, {pipeline_mode = #tpu.pipeline_mode<synchronous>, transform_indices = @transform_8, window_bounds = array<i64: 1, 128>}, {transform_indices = @transform_9, window_bounds = array<i64: 8, 128>}]} {
    %c0 = arith.constant 0 : index
    %c0_0 = arith.constant 0 : index
    %0 = vector.load %arg1[%c0, %c0_0] : memref<8x32xf32, #tpu.memory_space<vmem>>, vector<8x32xf32>
    %cst = arith.constant dense<0.000000e+00> : vector<8xf32>
    %1 = vector.multi_reduction <add>, %0, %cst [1] : vector<8x32xf32> to vector<8xf32>
    %2 = vector.shape_cast %1 : vector<8xf32> to vector<8x1xf32>
    %3 = arith.mulf %0, %0 : vector<8x32xf32>
    %cst_1 = arith.constant dense<0.000000e+00> : vector<8xf32>
    %4 = vector.multi_reduction <add>, %3, %cst_1 [1] : vector<8x32xf32> to vector<8xf32>
    %5 = vector.shape_cast %4 : vector<8xf32> to vector<8x1xf32>
    %cst_2 = arith.constant 3.125000e-02 : f32
    %6 = vector.broadcast %cst_2 : f32 to vector<8x1xf32>
    %7 = arith.mulf %2, %6 : vector<8x1xf32>
    %cst_3 = arith.constant 3.125000e-02 : f32
    %8 = vector.broadcast %cst_3 : f32 to vector<8x1xf32>
    %9 = arith.mulf %5, %8 : vector<8x1xf32>
    %10 = arith.mulf %7, %7 : vector<8x1xf32>
    %11 = arith.subf %9, %10 : vector<8x1xf32>
    %cst_4 = arith.constant 0.000000e+00 : f32
    %12 = vector.broadcast %cst_4 : f32 to vector<8x1xf32>
    %13 = arith.maximumf %11, %12 : vector<8x1xf32>
    %14 = vector.broadcast %7 : vector<8x1xf32> to vector<8x32xf32>
    %15 = arith.subf %0, %14 : vector<8x32xf32>
    %cst_5 = arith.constant 9.99999974E-6 : f32
    %16 = vector.broadcast %cst_5 : f32 to vector<8x1xf32>
    %17 = arith.addf %13, %16 : vector<8x1xf32>
    %18 = math.rsqrt %17 : vector<8x1xf32>
    %19 = vector.broadcast %18 : vector<8x1xf32> to vector<8x32xf32>
    %20 = arith.mulf %15, %19 : vector<8x32xf32>
    %c0_6 = arith.constant 0 : index
    %c0_7 = arith.constant 0 : index
    %21 = vector.load %arg2[%c0_6, %c0_7] : memref<1x32xf32, #tpu.memory_space<vmem>>, vector<1x32xf32>
    %22 = vector.broadcast %21 : vector<1x32xf32> to vector<8x32xf32>
    %23 = arith.mulf %20, %22 : vector<8x32xf32>
    %c0_8 = arith.constant 0 : index
    %c0_9 = arith.constant 0 : index
    %24 = vector.load %arg3[%c0_8, %c0_9] : memref<1x32xf32, #tpu.memory_space<vmem>>, vector<1x32xf32>
    %25 = vector.broadcast %24 : vector<1x32xf32> to vector<8x32xf32>
    %26 = arith.addf %23, %25 : vector<8x32xf32>
    %27 = arith.truncf %26 : vector<8x32xf32> to vector<8x32xbf16>
    %c0_10 = arith.constant 0 : index
    %c0_11 = arith.constant 0 : index
    %28 = vector.load %arg4[%c0_10, %c0_11] : memref<32x128xbf16, #tpu.memory_space<vmem>>, vector<32x128xbf16>
    %cst_12 = arith.constant dense<0.000000e+00> : vector<8x128xf32>
    %29 = tpu.matmul %27, %28, %cst_12 {dimension_numbers = #tpu.dot_dimension_numbers<[1], [0], [0], [1], [0, 0, 1, 1], [], []>} : vector<8x32xbf16>, vector<32x128xbf16>, vector<8x128xf32> -> vector<8x128xf32>
    %c0_13 = arith.constant 0 : index
    %c0_14 = arith.constant 0 : index
    %30 = vector.load %arg5[%c0_13, %c0_14] : memref<1x128xf32, #tpu.memory_space<vmem>>, vector<1x128xf32>
    %31 = vector.broadcast %30 : vector<1x128xf32> to vector<8x128xf32>
    %32 = arith.addf %29, %31 : vector<8x128xf32>
    %33 = arith.truncf %32 : vector<8x128xf32> to vector<8x128xbf16>
    %34 = arith.mulf %33, %33 : vector<8x128xbf16>
    %35 = arith.mulf %33, %34 : vector<8x128xbf16>
    %cst_15 = arith.constant 4.467770e-02 : bf16
    %36 = vector.broadcast %cst_15 : bf16 to vector<8x128xbf16>
    %37 = arith.mulf %36, %35 : vector<8x128xbf16>
    %38 = arith.addf %33, %37 : vector<8x128xbf16>
    %cst_16 = arith.constant 7.968750e-01 : bf16
    %39 = vector.broadcast %cst_16 : bf16 to vector<8x128xbf16>
    %40 = arith.mulf %39, %38 : vector<8x128xbf16>
    %41 = math.tanh %40 : vector<8x128xbf16>
    %cst_17 = arith.constant 1.000000e+00 : bf16
    %42 = vector.broadcast %cst_17 : bf16 to vector<8x128xbf16>
    %43 = arith.addf %42, %41 : vector<8x128xbf16>
    %cst_18 = arith.constant 5.000000e-01 : bf16
    %44 = vector.broadcast %cst_18 : bf16 to vector<8x128xbf16>
    %45 = arith.mulf %44, %43 : vector<8x128xbf16>
    %46 = arith.mulf %33, %45 : vector<8x128xbf16>
    %c0_19 = arith.constant 0 : index
    %c0_20 = arith.constant 0 : index
    %47 = vector.load %arg6[%c0_19, %c0_20] : memref<128x128xbf16, #tpu.memory_space<vmem>>, vector<128x128xbf16>
    %cst_21 = arith.constant dense<0.000000e+00> : vector<8x128xf32>
    %48 = tpu.matmul %46, %47, %cst_21 {dimension_numbers = #tpu.dot_dimension_numbers<[1], [0], [0], [1], [0, 0, 1, 1], [], []>} : vector<8x128xbf16>, vector<128x128xbf16>, vector<8x128xf32> -> vector<8x128xf32>
    %c0_22 = arith.constant 0 : index
    %c0_23 = arith.constant 0 : index
    %49 = vector.load %arg7[%c0_22, %c0_23] : memref<1x128xf32, #tpu.memory_space<vmem>>, vector<1x128xf32>
    %50 = vector.broadcast %49 : vector<1x128xf32> to vector<8x128xf32>
    %51 = arith.addf %48, %50 : vector<8x128xf32>
    %52 = arith.truncf %51 : vector<8x128xf32> to vector<8x128xbf16>
    %53 = arith.mulf %52, %52 : vector<8x128xbf16>
    %54 = arith.mulf %52, %53 : vector<8x128xbf16>
    %cst_24 = arith.constant 4.467770e-02 : bf16
    %55 = vector.broadcast %cst_24 : bf16 to vector<8x128xbf16>
    %56 = arith.mulf %55, %54 : vector<8x128xbf16>
    %57 = arith.addf %52, %56 : vector<8x128xbf16>
    %cst_25 = arith.constant 7.968750e-01 : bf16
    %58 = vector.broadcast %cst_25 : bf16 to vector<8x128xbf16>
    %59 = arith.mulf %58, %57 : vector<8x128xbf16>
    %60 = math.tanh %59 : vector<8x128xbf16>
    %cst_26 = arith.constant 1.000000e+00 : bf16
    %61 = vector.broadcast %cst_26 : bf16 to vector<8x128xbf16>
    %62 = arith.addf %61, %60 : vector<8x128xbf16>
    %cst_27 = arith.constant 5.000000e-01 : bf16
    %63 = vector.broadcast %cst_27 : bf16 to vector<8x128xbf16>
    %64 = arith.mulf %63, %62 : vector<8x128xbf16>
    %65 = arith.mulf %52, %64 : vector<8x128xbf16>
    %c0_28 = arith.constant 0 : index
    %c0_29 = arith.constant 0 : index
    %66 = vector.load %arg8[%c0_28, %c0_29] : memref<128x128xbf16, #tpu.memory_space<vmem>>, vector<128x128xbf16>
    %cst_30 = arith.constant dense<0.000000e+00> : vector<8x128xf32>
    %67 = tpu.matmul %65, %66, %cst_30 {dimension_numbers = #tpu.dot_dimension_numbers<[1], [0], [0], [1], [0, 0, 1, 1], [], []>} : vector<8x128xbf16>, vector<128x128xbf16>, vector<8x128xf32> -> vector<8x128xf32>
    %c0_31 = arith.constant 0 : index
    %c0_32 = arith.constant 0 : index
    %68 = vector.load %arg9[%c0_31, %c0_32] : memref<1x128xf32, #tpu.memory_space<vmem>>, vector<1x128xf32>
    %69 = vector.broadcast %68 : vector<1x128xf32> to vector<8x128xf32>
    %70 = arith.addf %67, %69 : vector<8x128xf32>
    %c0_33 = arith.constant 0 : index
    %c0_34 = arith.constant 0 : index
    %71 = vector.load %arg10[%c0_33, %c0_34] : memref<8x128xf32, #tpu.memory_space<vmem>>, vector<8x128xf32>
    tpu.vector_store %arg10[%c0_33, %c0_34], %70 {strides = array<i32>} : memref<8x128xf32, #tpu.memory_space<vmem>>, vector<8x128xf32>,
    return
  }
  func.func @transform_0(%arg0: i32) -> (i32, i32) {
    %c0_i32 = arith.constant 0 : i32
    %c0_i32_0 = arith.constant 0 : i32
    return %arg0, %c0_i32 : i32, i32
  }
  func.func @transform_1(%arg0: i32) -> (i32, i32) {
    %c0_i32 = arith.constant 0 : i32
    %c0_i32_0 = arith.constant 0 : i32
    %c0_i32_1 = arith.constant 0 : i32
    return %c0_i32, %c0_i32_0 : i32, i32
  }
  func.func @transform_2(%arg0: i32) -> (i32, i32) {
    %c0_i32 = arith.constant 0 : i32
    %c0_i32_0 = arith.constant 0 : i32
    %c0_i32_1 = arith.constant 0 : i32
    return %c0_i32, %c0_i32_0 : i32, i32
  }
  func.func @transform_3(%arg0: i32) -> (i32, i32) {
    %c0_i32 = arith.constant 0 : i32
    %c0_i32_0 = arith.constant 0 : i32
    %c0_i32_1 = arith.constant 0 : i32
    return %c0_i32, %c0_i32_0 : i32, i32
  }
  func.func @transform_4(%arg0: i32) -> (i32, i32) {
    %c0_i32 = arith.constant 0 : i32
    %c0_i32_0 = arith.constant 0 : i32
    %c0_i32_1 = arith.constant 0 : i32
    return %c0_i32, %c0_i32_0 : i32, i32
  }
  func.func @transform_5(%arg0: i32) -> (i32, i32) {
    %c0_i32 = arith.constant 0 : i32
    %c0_i32_0 = arith.constant 0 : i32
    %c0_i32_1 = arith.constant 0 : i32
    return %c0_i32, %c0_i32_0 : i32, i32
  }
  func.func @transform_6(%arg0: i32) -> (i32, i32) {
    %c0_i32 = arith.constant 0 : i32
    %c0_i32_0 = arith.constant 0 : i32
    %c0_i32_1 = arith.constant 0 : i32
    return %c0_i32, %c0_i32_0 : i32, i32
  }
  func.func @transform_7(%arg0: i32) -> (i32, i32) {
    %c0_i32 = arith.constant 0 : i32
    %c0_i32_0 = arith.constant 0 : i32
    %c0_i32_1 = arith.constant 0 : i32
    return %c0_i32, %c0_i32_0 : i32, i32
  }
  func.func @transform_8(%arg0: i32) -> (i32, i32) {
    %c0_i32 = arith.constant 0 : i32
    %c0_i32_0 = arith.constant 0 : i32
    %c0_i32_1 = arith.constant 0 : i32
    return %c0_i32, %c0_i32_0 : i32, i32
  }
  func.func @transform_9(%arg0: i32) -> (i32, i32) {
    %c0_i32 = arith.constant 0 : i32
    %c0_i32_0 = arith.constant 0 : i32
    return %arg0, %c0_i32 : i32, i32
  }
}

module attributes {stable_mosaic.version = 11 : i64} {
  func.func @_ffn_kernel(%arg0: i32, %arg1: memref<8x32xf32, #tpu.memory_space<vmem>>, %arg2: memref<1x32xf32, #tpu.memory_space<vmem>>, %arg3: memref<1x32xf32, #tpu.memory_space<vmem>>, %arg4: memref<32x128xbf16, #tpu.memory_space<vmem>>, %arg5: memref<1x128xf32, #tpu.memory_space<vmem>>, %arg6: memref<128x128xbf16, #tpu.memory_space<vmem>>, %arg7: memref<1x128xf32, #tpu.memory_space<vmem>>, %arg8: memref<128x128xbf16, #tpu.memory_space<vmem>>, %arg9: memref<1x128xf32, #tpu.memory_space<vmem>>, %arg10: memref<8x128xf32, #tpu.memory_space<vmem>>) attributes {dimension_semantics = [#tpu.dimension_semantics<parallel>], iteration_bounds = array<i64: 2>, scalar_prefetch = 0 : i64, scratch_operands = 0 : i64, tpu.core_type = #tpu.core_type<tc>, window_params = [{transform_indices = @transform_0, window_bounds = array<i64: 8, 32>}, {pipeline_mode = #tpu.pipeline_mode<synchronous>, transform_indices = @transform_1, window_bounds = array<i64: 1, 32>}, {pipeline_mode = #tpu.pipeline_mode<synchronous>, transform_indices = @transform_2, window_bounds = array<i64: 1, 32>}, {pipeline_mode = #tpu.pipeline_mode<synchronous>, transform_indices = @transform_3, window_bounds = array<i64: 32, 128>}, {pipeline_mode = #tpu.pipeline_mode<synchronous>, transform_indices = @transform_4, window_bounds = array<i64: 1, 128>}, {pipeline_mode = #tpu.pipeline_mode<synchronous>, transform_indices = @transform_5, window_bounds = array<i64: 128, 128>}, {pipeline_mode = #tpu.pipeline_mode<synchronous>, transform_indices = @transform_6, window_bounds = array<i64: 1, 128>}, {pipeline_mode = #tpu.pipeline_mode<synchronous>, transform_indices = @transform_7, window_bounds = array<i64: 128, 128>}, {pipeline_mode = #tpu.pipeline_mode<synchronous>, transform_indices = @transform_8, window_bounds = array<i64: 1, 128>}, {transform_indices = @transform_9, window_bounds = array<i64: 8, 128>}]} {
    %c0 = arith.constant 0 : index
    %c0_0 = arith.constant 0 : index
    %0 = vector.load %arg1[%c0, %c0_0] : memref<8x32xf32, #tpu.memory_space<vmem>>, vector<8x32xf32>
    %cst = arith.constant dense<0.000000e+00> : vector<8xf32>
    %1 = vector.multi_reduction <add>, %0, %cst [1] : vector<8x32xf32> to vector<8xf32>
    %2 = vector.shape_cast %1 : vector<8xf32> to vector<8x1xf32>
    %3 = arith.mulf %0, %0 : vector<8x32xf32>
    %cst_1 = arith.constant dense<0.000000e+00> : vector<8xf32>
    %4 = vector.multi_reduction <add>, %3, %cst_1 [1] : vector<8x32xf32> to vector<8xf32>
    %5 = vector.shape_cast %4 : vector<8xf32> to vector<8x1xf32>
    %cst_2 = arith.constant 3.125000e-02 : f32
    %6 = vector.broadcast %cst_2 : f32 to vector<8x1xf32>
    %7 = arith.mulf %2, %6 : vector<8x1xf32>
    %cst_3 = arith.constant 3.125000e-02 : f32
    %8 = vector.broadcast %cst_3 : f32 to vector<8x1xf32>
    %9 = arith.mulf %5, %8 : vector<8x1xf32>
    %10 = arith.mulf %7, %7 : vector<8x1xf32>
    %11 = arith.subf %9, %10 : vector<8x1xf32>
    %cst_4 = arith.constant 0.000000e+00 : f32
    %12 = vector.broadcast %cst_4 : f32 to vector<8x1xf32>
    %13 = arith.maximumf %11, %12 : vector<8x1xf32>
    %14 = vector.broadcast %7 : vector<8x1xf32> to vector<8x32xf32>
    %15 = arith.subf %0, %14 : vector<8x32xf32>
    %cst_5 = arith.constant 9.99999974E-6 : f32
    %16 = vector.broadcast %cst_5 : f32 to vector<8x1xf32>
    %17 = arith.addf %13, %16 : vector<8x1xf32>
    %18 = math.rsqrt %17 : vector<8x1xf32>
    %19 = vector.broadcast %18 : vector<8x1xf32> to vector<8x32xf32>
    %20 = arith.mulf %15, %19 : vector<8x32xf32>
    %c0_6 = arith.constant 0 : index
    %c0_7 = arith.constant 0 : index
    %21 = vector.load %arg2[%c0_6, %c0_7] : memref<1x32xf32, #tpu.memory_space<vmem>>, vector<1x32xf32>
    %22 = vector.broadcast %21 : vector<1x32xf32> to vector<8x32xf32>
    %23 = arith.mulf %20, %22 : vector<8x32xf32>
    %c0_8 = arith.constant 0 : index
    %c0_9 = arith.constant 0 : index
    %24 = vector.load %arg3[%c0_8, %c0_9] : memref<1x32xf32, #tpu.memory_space<vmem>>, vector<1x32xf32>
    %25 = vector.broadcast %24 : vector<1x32xf32> to vector<8x32xf32>
    %26 = arith.addf %23, %25 : vector<8x32xf32>
    %27 = arith.truncf %26 : vector<8x32xf32> to vector<8x32xbf16>
    %c0_10 = arith.constant 0 : index
    %c0_11 = arith.constant 0 : index
    %28 = vector.load %arg4[%c0_10, %c0_11] : memref<32x128xbf16, #tpu.memory_space<vmem>>, vector<32x128xbf16>
    %cst_12 = arith.constant dense<0.000000e+00> : vector<8x128xf32>
    %29 = tpu.matmul %27, %28, %cst_12 {dimension_numbers = #tpu.dot_dimension_numbers<[1], [0], [0], [1], [0, 0, 1, 1], [], []>} : vector<8x32xbf16>, vector<32x128xbf16>, vector<8x128xf32> -> vector<8x128xf32>
    %c0_13 = arith.constant 0 : index
    %c0_14 = arith.constant 0 : index
    %30 = vector.load %arg5[%c0_13, %c0_14] : memref<1x128xf32, #tpu.memory_space<vmem>>, vector<1x128xf32>
    %31 = vector.broadcast %30 : vector<1x128xf32> to vector<8x128xf32>
    %32 = arith.addf %29, %31 : vector<8x128xf32>
    %33 = arith.truncf %32 : vector<8x128xf32> to vector<8x128xbf16>
    %34 = arith.mulf %33, %33 : vector<8x128xbf16>
    %35 = arith.mulf %33, %34 : vector<8x128xbf16>
    %cst_15 = arith.constant 4.467770e-02 : bf16
    %36 = vector.broadcast %cst_15 : bf16 to vector<8x128xbf16>
    %37 = arith.mulf %36, %35 : vector<8x128xbf16>
    %38 = arith.addf %33, %37 : vector<8x128xbf16>
    %cst_16 = arith.constant 7.968750e-01 : bf16
    %39 = vector.broadcast %cst_16 : bf16 to vector<8x128xbf16>
    %40 = arith.mulf %39, %38 : vector<8x128xbf16>
    %41 = math.tanh %40 : vector<8x128xbf16>
    %cst_17 = arith.constant 1.000000e+00 : bf16
    %42 = vector.broadcast %cst_17 : bf16 to vector<8x128xbf16>
    %43 = arith.addf %42, %41 : vector<8x128xbf16>
    %cst_18 = arith.constant 5.000000e-01 : bf16
    %44 = vector.broadcast %cst_18 : bf16 to vector<8x128xbf16>
    %45 = arith.mulf %44, %43 : vector<8x128xbf16>
    %46 = arith.mulf %33, %45 : vector<8x128xbf16>
    %c0_19 = arith.constant 0 : index
    %c0_20 = arith.constant 0 : index
    %47 = vector.load %arg6[%c0_19, %c0_20] : memref<128x128xbf16, #tpu.memory_space<vmem>>, vector<128x128xbf16>
    %cst_21 = arith.constant dense<0.000000e+00> : vector<8x128xf32>
    %48 = tpu.matmul %46, %47, %cst_21 {dimension_numbers = #tpu.dot_dimension_numbers<[1], [0], [0], [1], [0, 0, 1, 1], [], []>} : vector<8x128xbf16>, vector<128x128xbf16>, vector<8x128xf32> -> vector<8x128xf32>
    %c0_22 = arith.constant 0 : index
    %c0_23 = arith.constant 0 : index
    %49 = vector.load %arg7[%c0_22, %c0_23] : memref<1x128xf32, #tpu.memory_space<vmem>>, vector<1x128xf32>
    %50 = vector.broadcast %49 : vector<1x128xf32> to vector<8x128xf32>
    %51 = arith.addf %48, %50 : vector<8x128xf32>
    %52 = arith.truncf %51 : vector<8x128xf32> to vector<8x128xbf16>
    %53 = arith.mulf %52, %52 : vector<8x128xbf16>
    %54 = arith.mulf %52, %53 : vector<8x128xbf16>
    %cst_24 = arith.constant 4.467770e-02 : bf16
    %55 = vector.broadcast %cst_24 : bf16 to vector<8x128xbf16>
    %56 = arith.mulf %55, %54 : vector<8x128xbf16>
    %57 = arith.addf %52, %56 : vector<8x128xbf16>
    %cst_25 = arith.constant 7.968750e-01 : bf16
    %58 = vector.broadcast %cst_25 : bf16 to vector<8x128xbf16>
    %59 = arith.mulf %58, %57 : vector<8x128xbf16>
    %60 = math.tanh %59 : vector<8x128xbf16>
    %cst_26 = arith.constant 1.000000e+00 : bf16
    %61 = vector.broadcast %cst_26 : bf16 to vector<8x128xbf16>
    %62 = arith.addf %61, %60 : vector<8x128xbf16>
    %cst_27 = arith.constant 5.000000e-01 : bf16
    %63 = vector.broadcast %cst_27 : bf16 to vector<8x128xbf16>
    %64 = arith.mulf %63, %62 : vector<8x128xbf16>
    %65 = arith.mulf %52, %64 : vector<8x128xbf16>
    %c0_28 = arith.constant 0 : index
    %c0_29 = arith.constant 0 : index
    %66 = vector.load %arg8[%c0_28, %c0_29] : memref<128x128xbf16, #tpu.memory_space<vmem>>, vector<128x128xbf16>
    %cst_30 = arith.constant dense<0.000000e+00> : vector<8x128xf32>
    %67 = tpu.matmul %65, %66, %cst_30 {dimension_numbers = #tpu.dot_dimension_numbers<[1], [0], [0], [1], [0, 0, 1, 1], [], []>} : vector<8x128xbf16>, vector<128x128xbf16>, vector<8x128xf32> -> vector<8x128xf32>
    %c0_31 = arith.constant 0 : index
    %c0_32 = arith.constant 0 : index
    %68 = vector.load %arg9[%c0_31, %c0_32] : memref<1x128xf32, #tpu.memory_space<vmem>>, vector<1x128xf32>
    %69 = vector.broadcast %68 : vector<1x128xf32> to vector<8x128xf32>
    %70 = arith.addf %67, %69 : vector<8x128xf32>
    %c0_33 = arith.constant 0 : index
    %c0_34 = arith.constant 0 : index
    %71 = vector.load %arg10[%c0_33, %c0_34] : memref<8x128xf32, #tpu.memory_space<vmem>>, vector<8x128xf32>
    tpu.vector_store %arg10[%c0_33, %c0_34], %70 {strides = array<i32>} : memref<8x128xf32, #tpu.memory_space<vmem>>, vector<8x128xf32>,
    return
  }
  func.func @transform_0(%arg0: i32) -> (i32, i32) {
    %c0_i32 = arith.constant 0 : i32
    %c0_i32_0 = arith.constant 0 : i32
    return %arg0, %c0_i32 : i32, i32
  }
  func.func @transform_1(%arg0: i32) -> (i32, i32) {
    %c0_i32 = arith.constant 0 : i32
    %c0_i32_0 = arith.constant 0 : i32
    %c0_i32_1 = arith.constant 0 : i32
    return %c0_i32, %c0_i32_0 : i32, i32
  }
  func.func @transform_2(%arg0: i32) -> (i32, i32) {
    %c0_i32 = arith.constant 0 : i32
    %c0_i32_0 = arith.constant 0 : i32
    %c0_i32_1 = arith.constant 0 : i32
    return %c0_i32, %c0_i32_0 : i32, i32
  }
  func.func @transform_3(%arg0: i32) -> (i32, i32) {
    %c0_i32 = arith.constant 0 : i32
    %c0_i32_0 = arith.constant 0 : i32
    %c0_i32_1 = arith.constant 0 : i32
    return %c0_i32, %c0_i32_0 : i32, i32
  }
  func.func @transform_4(%arg0: i32) -> (i32, i32) {
    %c0_i32 = arith.constant 0 : i32
    %c0_i32_0 = arith.constant 0 : i32
    %c0_i32_1 = arith.constant 0 : i32
    return %c0_i32, %c0_i32_0 : i32, i32
  }
  func.func @transform_5(%arg0: i32) -> (i32, i32) {
    %c0_i32 = arith.constant 0 : i32
    %c0_i32_0 = arith.constant 0 : i32
    %c0_i32_1 = arith.constant 0 : i32
    return %c0_i32, %c0_i32_0 : i32, i32
  }
  func.func @transform_6(%arg0: i32) -> (i32, i32) {
    %c0_i32 = arith.constant 0 : i32
    %c0_i32_0 = arith.constant 0 : i32
    %c0_i32_1 = arith.constant 0 : i32
    return %c0_i32, %c0_i32_0 : i32, i32
  }
  func.func @transform_7(%arg0: i32) -> (i32, i32) {
    %c0_i32 = arith.constant 0 : i32
    %c0_i32_0 = arith.constant 0 : i32
    %c0_i32_1 = arith.constant 0 : i32
    return %c0_i32, %c0_i32_0 : i32, i32
  }
  func.func @transform_8(%arg0: i32) -> (i32, i32) {
    %c0_i32 = arith.constant 0 : i32
    %c0_i32_0 = arith.constant 0 : i32
    %c0_i32_1 = arith.constant 0 : i32
    return %c0_i32, %c0_i32_0 : i32, i32
  }
  func.func @transform_9(%arg0: i32) -> (i32, i32) {
    %c0_i32 = arith.constant 0 : i32
    %c0_i32_0 = arith.constant 0 : i32
    return %arg0, %c0_i32 : i32, i32
  }
}

</mosaic_0001>

<bundles_post_ra>
// kernel: tpu_custom_call.1
= control target key start
LH: loop header
LB: loop body
LE: loop exit
PB: predicated region body
PF: predicated region fallthrough
CT: control target
= control target key end

     0   :  { %s1544_s0 = inlined_call_operand.hbm [shape: f32[16,32], index: 0, kind: input, shape index: {}]   ;;  %s1545_s1 = inlined_call_operand.vmem [shape: f32[1,32], index: 1, kind: input, shape index: {}]   ;;  %s1546_s2 = inlined_call_operand.vmem [shape: f32[1,32], index: 2, kind: input, shape index: {}]   ;;  %s1547_s3 = inlined_call_operand.hbm [shape: bf16[32,128], index: 3, kind: input, shape index: {}]   ;;  %s1548_s4 = inlined_call_operand.vmem [shape: f32[1,128], index: 4, kind: input, shape index: {}]   ;;  %s1549_s5 = inlined_call_operand.hbm [shape: bf16[128,128], index: 5, kind: input, shape index: {}]   ;;  %s1550_s6 = inlined_call_operand.vmem [shape: f32[1,128], index: 6, kind: input, shape index: {}]   ;;  %s1551_s7 = inlined_call_operand.hbm [shape: bf16[128,128], index: 7, kind: input, shape index: {}]   ;;  %s1552_s8 = inlined_call_operand.vmem [shape: f32[1,128], index: 8, kind: input, shape index: {}]   ;;  %s1553_s9 = inlined_call_operand.hbm [shape: f32[16,128], index: 9, kind: output, shape index: {}]  }
   0x1   :  { %1558 = sst [smem:[#allocation16_spill]] %s1547_s3 }
   0x2   :  { %1559 = sst [smem:[#allocation17_spill]] %s1549_s5 }
   0x3   :  { %1560 = sst [smem:[#allocation18_spill]] %s1551_s7 }
   0x4   :  { %14 = vsyncpa [#allocation3], 0 }
   0x5   :  { %16 = vsyncpa [#allocation3 + $0x1], 0 }
   0x6   :  { %17 = vsyncpa [#allocation6], 0 }
   0x7   :  { %18 = vsyncpa [#allocation9], 0 }
   0x8   :  { %19 = vsyncpa [#allocation4], 0 }
   0x9   :  { %21 = vsyncpa [#allocation4 + $0x1], 0  ;;  %s1309_s30 = smov 0   ;;  %s1311_s10 = smov 0  }
   0xa   :  { %s1313_s11 = smov 0   ;;  %s1315_s12 = smov 0  }
   0xb LB: > { %s1330_s13 = sadd.s32 4294967295, %s1248_s12   ;;  %s854_s14 = sadd.s32 4294967294, %s1248_s12   ;;  %s1248_s12 = sphi %s1315_s12, %s1585_s12   ;;  %s1244_s11 = sphi %s1313_s11, %s1584_s11   ;;  %s1240_s10 = sphi %s1311_s10, %s1583_s10   ;;  %s1236_s30 = sphi %s1309_s30, %s1582_s30  }
   0xc   : > { %p47_p0 = scmp.ne.s32.totalorder %s1240_s10, %s1236_s30  ;;  %p1554_p1 = scmp.eq.s32.totalorder %s1330_s13, 0 }
   0xd   : > { %p245_p3 = scmp.eq.s32.totalorder %s854_s14, 1  ;;  %p855_p5 = scmp.ge.s32.totalorder %s1248_s12, 1 }
   0xe   : > { %p1339_p4 = por %p1554_p1, %p47_p0  ;;  %p252_p7 = scmp.lt.s32.totalorder %s1248_s12, 3 }
   0xf   : > { %p1344_p6 = por %p245_p3, %p47_p0  ;;  %s1250_s18 = smov [#allocation5]  }
  0x10   : > { %s1561_s15 = scalar_select %p1339_p4, 1, 0 }
  0x11   : > { %s1562_s16 = scalar_select %p1344_p6, 1, 0 }
  0x12   : > { %p1349_p8 = pnand %p855_p5, %p252_p7  ;;  %s270_s19 = sshll.u32 %s1250_s18, 4  ;;  %s271_s19 = int_to_ptr.vmem [resolvable:$true] %s270_s19 }
  0x13   : > { %s1251_s21 = smov [#allocation7]   ;;  %s1252_s23 = smov [#allocation8]  }
  0x14   : > { %s1563_s17 = scalar_select %p1349_p8, 1, 0 }
  0x15   : > { %p981_p9 = pneg %p1349_p8  ;;  %s286_s22 = sshll.u32 %s1251_s21, 4  ;;  %s287_s22 = int_to_ptr.vmem [resolvable:$true] %s286_s22 }
  0x16   : > { %s302_s24 = sshll.u32 %s1252_s23, 4  ;;  %s1081_s25 = scalar_lea.vmem %s271_s19, 256  ;;  %s303_s24 = int_to_ptr.vmem [resolvable:$true] %s302_s24 }
  0x17   : > { %p1358_p11 = pnand %p981_p9, %p1554_p1  ;;  %p1082_p13 = scmp.ne.s32.totalorder %s271_s19, %s1081_s25 }
  0x18   : > { %p1089_p5 = scmp.lt.s32.totalorder %s271_s19, %s271_s19  ;;  %p1090_p7 = scmp.lt.s32.totalorder %s1081_s25, %s1081_s25 }
  0x19   : > { %p1072_p12 = pneg %p1358_p11 }
  0x1a   : > { %p1091_p9 = por %p1090_p7, %p1089_p5 }
  0x1b   : > { %p1084_p0 = pnand %p1082_p13, %p1072_p12 }
  0x1d   : > { %p1085_p3 = pneg %p1084_p0 }
  0x1f   : > { %p1092_p10 = pnand %p1091_p9, %p1085_p3 }
  0x21   : > { %1095 = shalt.err (!%p1092_p10)
}
  0x22   : > { %s1253_s26 = smov 64   ;;  %s1254_s27 = smov 4  }
  0x23   : > { %s1565_s3 = sld [smem:[#allocation16_spill]]  ;;  %s1107_s14 = scalar_lea.vmem %s287_s22, 1024 }
  0x24   : > { %p1108_p1 = scmp.ne.s32.totalorder %s287_s22, %s1107_s14  ;;  %p1115_p2 = scmp.lt.s32.totalorder %s287_s22, %s287_s22 }
  0x25   : > { %p1116_p6 = scmp.lt.s32.totalorder %s1107_s14, %s1107_s14 }
  0x26   : > { %p1110_p13 = pnand %p1108_p1, %p1072_p12 }
  0x27   : > { %p1117_p5 = por %p1116_p6, %p1115_p2 }
  0x28   : > { %p1111_p0 = pneg %p1110_p13 }
  0x29   : > { %984 = dma.hbm_to_vmem [thread:$0]  (!%p1358_p11), %s1565_s3, 256, %s271_s19, [#allocation6], %s1253_s26, %s1253_s26, %s1254_s27  }
  0x2a   : > { %p1118_p3 = pnand %p1117_p5, %p1111_p0 }
  0x2c   : > { %1121 = shalt.err (!%p1118_p3)
}
  0x2d   : > { %s1566_s5 = sld [smem:[#allocation17_spill]]  ;;  %s1133_s19 = scalar_lea.vmem %s303_s24, 1024 }
  0x2e   : > { %p1134_p10 = scmp.ne.s32.totalorder %s303_s24, %s1133_s19  ;;  %p1141_p9 = scmp.lt.s32.totalorder %s303_s24, %s303_s24 }
  0x2f   : > { %p1142_p13 = scmp.lt.s32.totalorder %s1133_s19, %s1133_s19 }
  0x30   : > { %p1136_p7 = pnand %p1134_p10, %p1072_p12 }
  0x31   : > { %p1143_p4 = por %p1142_p13, %p1141_p9 }
  0x32   : > { %p1137_p1 = pneg %p1136_p7 }
  0x33   : > { %987 = dma.hbm_to_vmem [thread:$0]  (!%p1358_p11), %s1566_s5, 1024, %s287_s22, [#allocation6], %s1253_s26, %s1253_s26, %s1254_s27  }
  0x34   : > { %p1144_p2 = pnand %p1143_p4, %p1137_p1 }
  0x36   : > { %1147 = shalt.err (!%p1144_p2)
}
  0x37   : > { %s1567_s7 = sld [smem:[#allocation18_spill]]  ;;  %s1389_s22 = sadd.s32 1, %s1248_s12  }
  0x38   : > { %s31_s28 = ssub.s32 %s1248_s12, %s1389_s22  ;;  %s34_s20 = sadd.s32 1, %s1244_s11 }
  0x39   : > { %p32_p4 = scmp.eq.s32.totalorder %s31_s28, 0  ;;  %p41_p6 = scmp.ne.s32.totalorder %s1244_s11, %s1240_s10 }
  0x3a   : > { %p42_p12 = scmp.eq.s32.totalorder %s1248_s12, 0  ;;  %p1002_p0 = scmp.lt.s32.totalorder %s1248_s12, 2 }
  0x3b   : > { %s1399_s29 = scalar_select %p32_p4, %s1244_s11, %s34_s20  }
  0x3c   : > { %p43_p5 = por %p42_p12, %p41_p6  ;;  %p1569_p3 = scmp.eq.s32.totalorder %s1330_s13, 1 }
  0x3d   : > { %990 = dma.hbm_to_vmem [thread:$0]  (!%p1358_p11), %s1567_s7, 1024, %s303_s24, [#allocation9], %s1253_s26, %s1253_s26, %s1254_s27  }
  0x3e   : > { %1568 = sst [smem:[#allocation15_spill]] %s1399_s29  ;;  %p1403_p10 = por %p1569_p3, %p41_p6 }
  0x3f   : > { %s319_s18 = sand.u32 1, %s1244_s11   ;;  %s861_s21 = sshll.u32 %s1248_s12, 7 }
  0x40   : > { %s1570_s14 = scalar_select %p1403_p10, 1, 0 }
  0x41   : > { %s860_s24 = sshll.u32 %s319_s18, 3  ;;  %s1412_s19 = scalar_lea.hbm %s1544_s0, %s861_s21 }
  0x42   : > { %s323_s23 = scalar_lea.vmem [#allocation2], %s860_s24  ;;  %p1414_p11 = pnand %p1002_p0, %p43_p5 }
  0x43   : > { %s330_s25 = sshll.u32 %s323_s23, 4  ;;  %s320_s20 = scalar_lea.sflag [#allocation3], %s319_s18  ;;  %s331_s25 = int_to_ptr.vmem [resolvable:$true] %s330_s25 }
  0x44   : > { %s1148_s3 = scalar_lea.hbm %s1412_s19, 128  ;;  %p1150_p1 = pneg %p1414_p11 }
  0x45   : > { %p1149_p7 = scmp.ne.s32.totalorder %s1412_s19, %s1148_s3  ;;  %s1153_s27 = scalar_lea.hbm %s1544_s0, 256 }
  0x46   : > { %p1154_p2 = scmp.lt.s32.totalorder %s1412_s19, %s1544_s0  ;;  %p1155_p4 = scmp.lt.s32.totalorder %s1153_s27, %s1148_s3 }
  0x47   : > { %p1151_p9 = pnand %p1150_p1, %p1149_p7 }
  0x48   : > { %p1156_p6 = por %p1155_p4, %p1154_p2 }
  0x49   : > { %p1152_p13 = pneg %p1151_p9 }
  0x4b   : > { %p1157_p12 = pnand %p1156_p6, %p1152_p13 }
  0x4d   : > { %1160 = shalt.err (!%p1157_p12)
}
  0x4e   : > { %s1161_s23 = scalar_lea.vmem %s331_s25, 128  ;;  %s1255_s18 = smov [#allocation2]  }
  0x4f   : > { %p1162_p0 = scmp.ne.s32.totalorder %s331_s25, %s1161_s23  ;;  %s1166_s7 = sshll.u32 %s1255_s18, 4  ;;  %s1167_s7 = int_to_ptr.vmem [resolvable:$false] %s1166_s7 }
  0x50   : > { %s1168_s29 = scalar_lea.vmem %s1167_s7, 256  ;;  %p1169_p7 = scmp.lt.s32.totalorder %s331_s25, %s1167_s7 }
  0x51   : > { %p1164_p5 = pnand %p1162_p0, %p1150_p1  ;;  %p1170_p9 = scmp.lt.s32.totalorder %s1168_s29, %s1161_s23 }
  0x53   : > { %p1165_p3 = pneg %p1164_p5  ;;  %p1171_p10 = por %p1170_p9, %p1169_p7 }
  0x55   : > { %p1172_p8 = pnand %p1171_p10, %p1165_p3 }
  0x57   : > { %1175 = shalt.err (!%p1172_p8)
}
  0x58   : > { %994 = dma.hbm_to_vmem [thread:$0]  (!%p1414_p11), %s1412_s19, 128, %s331_s25, %s320_s20  }
  0x59   : > { %p1572_p13 = scmp.ne.s32.totalorder %s1563_s17, 0 }
  0x5a   : > { %s1435_s3 = sand.u32 (!%p1572_p13), 1, %s1240_s10   ;;  %p1573_p10 = scmp.ne.s32.totalorder (!%p1572_p13), %s1561_s15, 0 }
  0x5b   : > { %339 = sbr.rel (%p1572_p13) target bundleno = 942 (0x3ae), region = 56  ;;  %s863_s5 = sshll.u32 (!%p1572_p13), %s1435_s3, 3 }
  0x5c   : > { %s342_s7 = scalar_lea.sflag (!%p1572_p13), [#allocation3], %s1435_s3  ;;  %s345_s29 = scalar_lea.vmem (!%p1572_p13), [#allocation2], %s863_s5 }
  0x60   : > { %1219 = dma.done.wait (%p1573_p10), %s342_s7, 128  }
  0x61   : > { %1221 = vsyncadd (%p1573_p10), %s342_s7, 4294967168  ;;  %p1574_p8 = scmp.eq.s32.totalorder %s1330_s13, 0 }
  0x63   : > { %1223 = dma.done.wait (%p1574_p8), [#allocation6], 1280   ;;  %p1575_p11 = pmov %p1574_p8 }
  0x64   : > { %p1576_p1 = pmov %p1574_p8 }
  0x65   : > { %1225 = vsyncadd (%p1575_p11), [#allocation6], 4294966016 }
  0x66   : > { %1227 = dma.done.wait (%p1576_p1), [#allocation9], 1024   ;;  %p1577_p2 = pmov %p1576_p1 }
  0x67   : > { %vm398_vm0 = vcmask 261120   ;;  %v397_v0 = vld [vmem:[%s345_s29] sm:$0xff]  ;;  %v1046_v4 = vld [vmem:[#allocation5 + $0x8] sm:$0xff]   ;;  %v1256_v5 = vmov 0.0   ;;  %vm1257_vm1 = vmmov 0   ;;  %v1047_v6 = vld [vmem:[#allocation5] sm:$0xff]  }
  0x68   : > { %1229 = vsyncadd (%p1577_p2), [#allocation9], 4294966272  ;;  %v399_v1 = vsel %vm398_vm0, %v397_v0, 0.0  ;;  %v402_v2 = vmul.f32 %v397_v0, %v397_v0  ;;  %917 = vmatprep.subr.bf16.mxu0 %v1256_v5  ;;  %921 = vmatprep.mubr.msk.bf16.mxu0 %vm1257_vm1, %v1256_v5  ;;  %v868_v17 = vld [vmem:[%s1545_s1] ss:$0 sm:$0xff]  ;;  %v1048_v23 = vld [vmem:[#allocation7 + $0x38] sm:$0xff]  }
  0x69   : > { %400 = vadd.xlane.f32.xlu0 %v399_v1  ;;  %918 = vmatpush3.bf16.msra.mxu0 %v1046_v4  ;;  %v869_v19 = vld [vmem:[%s1546_s2] ss:$0 sm:$0xff]  ;;  %v1049_v24 = vld [vmem:[#allocation7 + $0x30] sm:$0xff]   ;;  %v1050_v25 = vld [vmem:[#allocation7 + $0x28] sm:$0xff]   ;;  %s893_s23 = sshll.u32 %s1330_s13, 7  ;;  %s391_s18 = scalar_lea.vmem [#allocation10], %s863_s5 }
  0x6a   : > { %v403_v3 = vsel %vm398_vm0, %v402_v2, 0.0  ;;  %925 = vmatprep.subr.bf16.mxu1 %v1256_v5  ;;  %919 = vmatprep.subr.bf16.mxu0 %v1256_v5  ;;  %v1051_v26 = vld [vmem:[#allocation7 + $0x20] sm:$0xff]   ;;  %v1052_v27 = vld [vmem:[#allocation7 + $0x18] sm:$0xff]   ;;  %v1053_v28 = vld [vmem:[#allocation7 + $0x10] sm:$0xff]   ;;  %s755_s7 = sshll.u32 %s391_s18, 4  ;;  %s1501_s17 = scalar_lea.hbm %s1553_s9, %s893_s23  ;;  %s1503_s7 = int_to_ptr.vmem [resolvable:$true] %s755_s7 }
  0x6b   : > { %941 = vmatprep.mubr.msk.bf16.mxu1 %vm1257_vm1, %v1256_v5  ;;  %926 = vmatpush3.bf16.msra.mxu1 %v1048_v23  ;;  %v1054_v29 = vld [vmem:[#allocation7 + $0x8] sm:$0xff]   ;;  %v1055_v30 = vld [vmem:[#allocation7] sm:$0xff]   ;;  %v1056_v47 = vld [vmem:[#allocation8 + $0x38] sm:$0xff]   ;;  %s742_s19 = scalar_lea.sflag [#allocation4], %s1435_s3  ;;  %s1176_s13 = scalar_lea.vmem %s1503_s7, 128 }
  0x6c   : > { %927 = vmatprep.subr.bf16.mxu1 %v1256_v5  ;;  %v870_v31 = vld [vmem:[%s1548_s4] ss:$0 sm:$0xff]  ;;  %v1057_v48 = vld [vmem:[#allocation8 + $0x30] sm:$0xff]   ;;  %v1058_v49 = vld [vmem:[#allocation8 + $0x28] sm:$0xff]   ;;  %p1177_p4 = scmp.ne.s32.totalorder %s1503_s7, %s1176_s13  ;;  %p1578_p6 = scmp.ne.s32.totalorder %s1570_s14, 0 }
  0x6d   : > { %404 = vadd.xlane.f32.xlu0 %v403_v3  ;;  %920 = vmatpush3.bf16.msra.mxu0 %v1047_v6  ;;  %v1059_v50 = vld [vmem:[#allocation8 + $0x20] sm:$0xff]   ;;  %v1060_v51 = vld [vmem:[#allocation8 + $0x18] sm:$0xff]   ;;  %v1061_v52 = vld [vmem:[#allocation8 + $0x10] sm:$0xff]   ;;  %s1258_s5 = smov [#allocation10]  }
  0x6e   : > { %945 = vmatprep.subr.bf16.mxu0 %v1256_v5  ;;  %v1062_v53 = vld [vmem:[#allocation8 + $0x8] sm:$0xff]   ;;  %v1063_v54 = vld [vmem:[#allocation8] sm:$0xff]   ;;  %p1178_p12 = pnand %p1177_p4, %p1578_p6  ;;  %s1180_s25 = sshll.u32 %s1258_s5, 4  ;;  %s1181_s25 = int_to_ptr.vmem [resolvable:$false] %s1180_s25 }
  0x6f   : > { %928 = vmatpush3.bf16.msra.mxu1 %v1049_v24  ;;  %v874_v55 = vld [vmem:[%s1550_s6] ss:$0 sm:$0xff]  ;;  %s1182_s28 = scalar_lea.vmem %s1181_s25, 256  ;;  %p1183_p5 = scmp.lt.s32.totalorder %s1503_s7, %s1181_s25 }
  0x70   : > { %929 = vmatprep.subr.bf16.mxu1 %v1256_v5  ;;  %p1179_p0 = pneg %p1178_p12  ;;  %p1184_p3 = scmp.lt.s32.totalorder %s1182_s28, %s1176_s13 }
  0x72   : > { %p1185_p7 = por %p1184_p3, %p1183_p5 }
  0x73   : > { %930 = vmatpush3.bf16.msra.mxu1 %v1050_v25 }
  0x74   : > { %931 = vmatprep.subr.bf16.mxu1 %v1256_v5  ;;  %p1186_p9 = pnand %p1185_p7, %p1179_p0 }
  0x77   : > { %932 = vmatpush3.bf16.msra.mxu1 %v1051_v26 }
  0x78   : > { %933 = vmatprep.subr.bf16.mxu1 %v1256_v5 }
  0x7b   : > { %934 = vmatpush3.bf16.msra.mxu1 %v1052_v27 }
  0x7c   : > { %935 = vmatprep.subr.bf16.mxu1 %v1256_v5 }
  0x7f   : > { %936 = vmatpush3.bf16.msra.mxu1 %v1053_v28 }
  0x80   : > { %937 = vmatprep.subr.bf16.mxu1 %v1256_v5 }
  0x83   : > { %938 = vmatpush3.bf16.msra.mxu1 %v1054_v29 }
  0x84   : > { %939 = vmatprep.subr.bf16.mxu1 %v1256_v5 }
  0x87   : > { %940 = vmatpush3.bf16.msra.mxu1 %v1055_v30 }
  0xf2   : > { %v401_v7 = vpop.xlane.xlu0 %400 }
  0xf3   : > { %v406_v8 = vmul.f32 0.03125, %v401_v7  ;;  %v883_v7 = vld [vmem:[%s1552_s8] ss:$0 sm:$0xff] }
  0xf5   : > { %v408_v10 = vmul.f32 %v406_v8, %v406_v8  ;;  %v411_v15 = vsub.f32 %v397_v0, %v406_v8 }
  0xf6   : > { %v405_v9 = vpop.xlane.xlu0 %404 }
  0xf7   : > { %v407_v11 = vmul.f32 0.03125, %v405_v9 }
  0xf9   : > { %v409_v12 = vsub.f32 %v407_v11, %v408_v10 }
  0xfb   : > { %v410_v13 = vmax.f32 %v409_v12, 0.0 }
  0xfd   : > { %v412_v14 = vadd.f32 1e-05, %v410_v13 }
  0xff   : > { %1064 = vrsqrt.f32 %v412_v14 }
 0x10c   : > { %v1065_v16 = vpop.eup %1064 }
 0x10d   : > { %v414_v18 = vmul.f32 %v1065_v16, %v411_v15 }
 0x10f   : > { %v422_v20 = vmul.f32 %v868_v17, %v414_v18 }
 0x111   : > { %v430_v21 = vadd.f32 %v869_v19, %v422_v20 }
 0x113   : > { %v431_v22 = vpack.c.bf16 %v430_v21, %v430_v21 }
 0x115   : > { %922 = vmatmul.mubr.msk.bf16.vlgmr.msra.gmra.mxu0 %vm398_vm0, %v431_v22 }
 0x116   : > { %961 = vmatprep.mubr.msk.bf16.mxu0 %vm1257_vm1, %v1256_v5  ;;  %946 = vmatpush3.bf16.msra.mxu0 %v1056_v47 }
 0x117   : > { %947 = vmatprep.subr.bf16.mxu0 %v1256_v5 }
 0x11a   : > { %948 = vmatpush3.bf16.msra.mxu0 %v1057_v48 }
 0x11b   : > { %949 = vmatprep.subr.bf16.mxu0 %v1256_v5 }
 0x11e   : > { %950 = vmatpush3.bf16.msra.mxu0 %v1058_v49 }
 0x11f   : > { %951 = vmatprep.subr.bf16.mxu0 %v1256_v5 }
 0x122   : > { %952 = vmatpush3.bf16.msra.mxu0 %v1059_v50 }
 0x123   : > { %953 = vmatprep.subr.bf16.mxu0 %v1256_v5 }
 0x126   : > { %954 = vmatpush3.bf16.msra.mxu0 %v1060_v51 }
 0x127   : > { %955 = vmatprep.subr.bf16.mxu0 %v1256_v5 }
 0x12a   : > { %956 = vmatpush3.bf16.msra.mxu0 %v1061_v52 }
 0x12b   : > { %957 = vmatprep.subr.bf16.mxu0 %v1256_v5 }
 0x12e   : > { %958 = vmatpush3.bf16.msra.mxu0 %v1062_v53 }
 0x12f   : > { %959 = vmatprep.subr.bf16.mxu0 %v1256_v5 }
 0x132   : > { %960 = vmatpush3.bf16.msra.mxu0 %v1063_v54 }
 0x1d5   : > { %v492_v32 = vpop.f32.mrf.mxu0 }
 0x1d6   : > { %v493_v33 = vadd.f32 %v870_v31, %v492_v32 }
 0x1d7   : > { %v923_v34 = vpop.f32.mrf.mxu0 }
 0x1d8   : > { %v498_v35 = vpack.c.bf16 %v493_v33, %v493_v33 }
 0x1d9   : > { %v495_v36 = vpop.f32.mrf.mxu0 }
 0x1da   : > { %v499_v37 = vmul.bf16 %v498_v35, %v498_v35 }
 0x1db   : > { %v924_v38 = vpop.f32.mrf.mxu0 }
 0x1dc   : > { %v500_v39 = vmul.bf16 %v499_v37, %v498_v35 }
 0x1de   : > { %v501_v40 = vmul.bf16 1027030327, %v500_v39 }
 0x1e0   : > { %v502_v41 = vadd.bf16 %v501_v40, %v498_v35 }
 0x1e2   : > { %v503_v42 = vmul.bf16 1061961548, %v502_v41 }
 0x1e4   : > { %1066 = vtanh.bf16 %v503_v42 }
 0x1f2   : > { %v1067_v43 = vpop.eup %1066 }
 0x1f3   : > { %v505_v44 = vadd.bf16 1065369472, %v1067_v43 }
 0x1f5   : > { %v506_v45 = vmul.bf16 1056980736, %v505_v44 }
 0x1f7   : > { %v507_v46 = vmul.bf16 %v506_v45, %v498_v35 }
 0x1f9   : > { %942 = vmatmul.mubr.bf16.vlgmr.msra.gmra.mxu1 %v507_v46 }
 0x2b9   : > { %v613_v56 = vpop.f32.mrf.mxu1 }
 0x2ba   : > { %v614_v57 = vadd.f32 %v874_v55, %v613_v56 }
 0x2bb   : > { %v943_v58 = vpop.f32.mrf.mxu1 }
 0x2bc   : > { %v619_v59 = vpack.c.bf16 %v614_v57, %v614_v57 }
 0x2bd   : > { %v616_v60 = vpop.f32.mrf.mxu1 }
 0x2be   : > { %v620_v61 = vmul.bf16 %v619_v59, %v619_v59 }
 0x2bf   : > { %v944_v62 = vpop.f32.mrf.mxu1 }
 0x2c0   : > { %v621_v63 = vmul.bf16 %v620_v61, %v619_v59 }
 0x2c2   : > { %v622_v0 = vmul.bf16 1027030327, %v621_v63 }
 0x2c4   : > { %v623_v1 = vadd.bf16 %v622_v0, %v619_v59 }
 0x2c6   : > { %v624_v2 = vmul.bf16 1061961548, %v623_v1 }
 0x2c8   : > { %1068 = vtanh.bf16 %v624_v2 }
 0x2d6   : > { %v1069_v3 = vpop.eup %1068 }
 0x2d7   : > { %v626_v4 = vadd.bf16 1065369472, %v1069_v3 }
 0x2d9   : > { %v627_v5 = vmul.bf16 1056980736, %v626_v4 }
 0x2db   : > { %v628_v6 = vmul.bf16 %v627_v5, %v619_v59 }
 0x2dd   : > { %962 = vmatmul.mubr.bf16.vlgmr.msra.gmra.mxu0 %v628_v6 }
 0x39d   : > { %v734_v8 = vpop.f32.mrf.mxu0 }
 0x39e   : > { %v735_v9 = vadd.f32 %v883_v7, %v734_v8 }
 0x39f   : > { %v963_v10 = vpop.f32.mrf.mxu0 }
 0x3a0   : > { %740 = vst [vmem:[%s391_s18] sm:$0xff] %v735_v9 }
 0x3a1   : > { %v737_v11 = vpop.f32.mrf.mxu0 }
 0x3a2   : > { %1189 = shalt.err (!%p1186_p9)
}
 0x3a3   : > { %s1190_s20 = scalar_lea.hbm %s1501_s17, 128  ;;  %s1194_s26 = scalar_lea.hbm %s1553_s9, 256 }
 0x3a4   : > { %p1191_p13 = scmp.ne.s32.totalorder %s1501_s17, %s1190_s20  ;;  %p1195_p11 = scmp.lt.s32.totalorder %s1501_s17, %s1553_s9 }
 0x3a5   : > { %p1196_p1 = scmp.lt.s32.totalorder %s1194_s26, %s1190_s20 }
 0x3a6   : > { %p1192_p10 = pnand %p1191_p13, %p1578_p6 }
 0x3a7   : > { %p1197_p2 = por %p1196_p1, %p1195_p11 }
 0x3a8   : > { %p1193_p8 = pneg %p1192_p10 }
 0x3aa   : > { %p1198_p4 = pnand %p1197_p2, %p1193_p8 }
 0x3ac   : > { %1201 = shalt.err (!%p1198_p4)
}
 0x3ad   : > { %979 = dma.vmem_to_hbm [thread:$0]  (%p1578_p6), %s1503_s7, 128, %s1501_s17, %s742_s19   ;;  %v964_v12 = vpop.f32.mrf.mxu0 }
 0x3ae PF: > { %s767_s23 = sand.u32 1, %s1236_s30   ;;  %p1579_p12 = scmp.ne.s32.totalorder %s1562_s16, 0 }
 0x3af   : > { %p1580_p0 = scmp.ge.s32.totalorder %s1248_s12, 2  ;;  %s768_s18 = scalar_lea.sflag [#allocation4], %s767_s23 }
 0x3b1   : > { %p996_p5 = pnand %p1580_p0, %p1579_p12 }
 0x3b3   : > { %p997_p3 = pneg %p996_p5 }
 0x3b5   : > { %1231 = dma.done.wait (%p997_p3), %s768_s18, 128  }
 0x3b6   : > { %1233 = vsyncadd (%p997_p3), %s768_s18, 4294967168  ;;  %s1581_s14 = sld [smem:[#allocation15_spill]]  ;;  %p24_p7 = scmp.ge.s32.totalorder %s1389_s22, 4  }
 0x3b7   : > { %s1582_s30 = smov %s1240_s10  ;;  %s1583_s10 = smov %s1244_s11 }
 0x3b8   : > { %s1585_s12 = smov %s1389_s22  ;;  %26 = sbr.rel (!%p24_p7) target bundleno = 11 (0xb), region = 113 }
 0x3bc   : > { %s1584_s11 = smov %s1581_s14 }
 0x3bd   :  { %773 = vsyncpa [#allocation3], 1 }
 0x3be   :  { %775 = vsyncpa [#allocation3 + $0x1], 1 }
 0x3bf   :  { %776 = vsyncpa [#allocation6], 1 }
 0x3c0   :  { %777 = vsyncpa [#allocation9], 1 }
 0x3c1   :  { %778 = vsyncpa [#allocation4], 1 }
 0x3c2   :  { %780 = vsyncpa [#allocation4 + $0x1], 1 }

// kernel: tpu_custom_call.1
= control target key start
LH: loop header
LB: loop body
LE: loop exit
PB: predicated region body
PF: predicated region fallthrough
CT: control target
= control target key end

     0   :  { %s1544_s0 = inlined_call_operand.hbm [shape: f32[16,32], index: 0, kind: input, shape index: {}]   ;;  %s1545_s1 = inlined_call_operand.vmem [shape: f32[1,32], index: 1, kind: input, shape index: {}]   ;;  %s1546_s2 = inlined_call_operand.vmem [shape: f32[1,32], index: 2, kind: input, shape index: {}]   ;;  %s1547_s3 = inlined_call_operand.hbm [shape: bf16[32,128], index: 3, kind: input, shape index: {}]   ;;  %s1548_s4 = inlined_call_operand.vmem [shape: f32[1,128], index: 4, kind: input, shape index: {}]   ;;  %s1549_s5 = inlined_call_operand.hbm [shape: bf16[128,128], index: 5, kind: input, shape index: {}]   ;;  %s1550_s6 = inlined_call_operand.vmem [shape: f32[1,128], index: 6, kind: input, shape index: {}]   ;;  %s1551_s7 = inlined_call_operand.hbm [shape: bf16[128,128], index: 7, kind: input, shape index: {}]   ;;  %s1552_s8 = inlined_call_operand.vmem [shape: f32[1,128], index: 8, kind: input, shape index: {}]   ;;  %s1553_s9 = inlined_call_operand.hbm [shape: f32[16,128], index: 9, kind: output, shape index: {}]  }
   0x1   :  { %1558 = sst [smem:[#allocation16_spill]] %s1547_s3 }
   0x2   :  { %1559 = sst [smem:[#allocation17_spill]] %s1549_s5 }
   0x3   :  { %1560 = sst [smem:[#allocation18_spill]] %s1551_s7 }
   0x4   :  { %14 = vsyncpa [#allocation3], 0 }
   0x5   :  { %16 = vsyncpa [#allocation3 + $0x1], 0 }
   0x6   :  { %17 = vsyncpa [#allocation6], 0 }
   0x7   :  { %18 = vsyncpa [#allocation9], 0 }
   0x8   :  { %19 = vsyncpa [#allocation4], 0 }
   0x9   :  { %21 = vsyncpa [#allocation4 + $0x1], 0  ;;  %s1309_s30 = smov 0   ;;  %s1311_s10 = smov 0  }
   0xa   :  { %s1313_s11 = smov 0   ;;  %s1315_s12 = smov 0  }
   0xb LB: > { %s1330_s13 = sadd.s32 4294967295, %s1248_s12   ;;  %s854_s14 = sadd.s32 4294967294, %s1248_s12   ;;  %s1248_s12 = sphi %s1315_s12, %s1585_s12   ;;  %s1244_s11 = sphi %s1313_s11, %s1584_s11   ;;  %s1240_s10 = sphi %s1311_s10, %s1583_s10   ;;  %s1236_s30 = sphi %s1309_s30, %s1582_s30  }
   0xc   : > { %p47_p0 = scmp.ne.s32.totalorder %s1240_s10, %s1236_s30  ;;  %p1554_p1 = scmp.eq.s32.totalorder %s1330_s13, 0 }
   0xd   : > { %p245_p3 = scmp.eq.s32.totalorder %s854_s14, 1  ;;  %p855_p5 = scmp.ge.s32.totalorder %s1248_s12, 1 }
   0xe   : > { %p1339_p4 = por %p1554_p1, %p47_p0  ;;  %p252_p7 = scmp.lt.s32.totalorder %s1248_s12, 3 }
   0xf   : > { %p1344_p6 = por %p245_p3, %p47_p0  ;;  %s1250_s18 = smov [#allocation5]  }
  0x10   : > { %s1561_s15 = scalar_select %p1339_p4, 1, 0 }
  0x11   : > { %s1562_s16 = scalar_select %p1344_p6, 1, 0 }
  0x12   : > { %p1349_p8 = pnand %p855_p5, %p252_p7  ;;  %s270_s19 = sshll.u32 %s1250_s18, 4  ;;  %s271_s19 = int_to_ptr.vmem [resolvable:$true] %s270_s19 }
  0x13   : > { %s1251_s21 = smov [#allocation7]   ;;  %s1252_s23 = smov [#allocation8]  }
  0x14   : > { %s1563_s17 = scalar_select %p1349_p8, 1, 0 }
  0x15   : > { %p981_p9 = pneg %p1349_p8  ;;  %s286_s22 = sshll.u32 %s1251_s21, 4  ;;  %s287_s22 = int_to_ptr.vmem [resolvable:$true] %s286_s22 }
  0x16   : > { %s302_s24 = sshll.u32 %s1252_s23, 4  ;;  %s1081_s25 = scalar_lea.vmem %s271_s19, 256  ;;  %s303_s24 = int_to_ptr.vmem [resolvable:$true] %s302_s24 }
  0x17   : > { %p1358_p11 = pnand %p981_p9, %p1554_p1  ;;  %p1082_p13 = scmp.ne.s32.totalorder %s271_s19, %s1081_s25 }
  0x18   : > { %p1089_p5 = scmp.lt.s32.totalorder %s271_s19, %s271_s19  ;;  %p1090_p7 = scmp.lt.s32.totalorder %s1081_s25, %s1081_s25 }
  0x19   : > { %p1072_p12 = pneg %p1358_p11 }
  0x1a   : > { %p1091_p9 = por %p1090_p7, %p1089_p5 }
  0x1b   : > { %p1084_p0 = pnand %p1082_p13, %p1072_p12 }
  0x1d   : > { %p1085_p3 = pneg %p1084_p0 }
  0x1f   : > { %p1092_p10 = pnand %p1091_p9, %p1085_p3 }
  0x21   : > { %1095 = shalt.err (!%p1092_p10)
}
  0x22   : > { %s1253_s26 = smov 64   ;;  %s1254_s27 = smov 4  }
  0x23   : > { %s1565_s3 = sld [smem:[#allocation16_spill]]  ;;  %s1107_s14 = scalar_lea.vmem %s287_s22, 1024 }
  0x24   : > { %p1108_p1 = scmp.ne.s32.totalorder %s287_s22, %s1107_s14  ;;  %p1115_p2 = scmp.lt.s32.totalorder %s287_s22, %s287_s22 }
  0x25   : > { %p1116_p6 = scmp.lt.s32.totalorder %s1107_s14, %s1107_s14 }
  0x26   : > { %p1110_p13 = pnand %p1108_p1, %p1072_p12 }
  0x27   : > { %p1117_p5 = por %p1116_p6, %p1115_p2 }
  0x28   : > { %p1111_p0 = pneg %p1110_p13 }
  0x29   : > { %984 = dma.hbm_to_vmem [thread:$0]  (!%p1358_p11), %s1565_s3, 256, %s271_s19, [#allocation6], %s1253_s26, %s1253_s26, %s1254_s27  }
  0x2a   : > { %p1118_p3 = pnand %p1117_p5, %p1111_p0 }
  0x2c   : > { %1121 = shalt.err (!%p1118_p3)
}
  0x2d   : > { %s1566_s5 = sld [smem:[#allocation17_spill]]  ;;  %s1133_s19 = scalar_lea.vmem %s303_s24, 1024 }
  0x2e   : > { %p1134_p10 = scmp.ne.s32.totalorder %s303_s24, %s1133_s19  ;;  %p1141_p9 = scmp.lt.s32.totalorder %s303_s24, %s303_s24 }
  0x2f   : > { %p1142_p13 = scmp.lt.s32.totalorder %s1133_s19, %s1133_s19 }
  0x30   : > { %p1136_p7 = pnand %p1134_p10, %p1072_p12 }
  0x31   : > { %p1143_p4 = por %p1142_p13, %p1141_p9 }
  0x32   : > { %p1137_p1 = pneg %p1136_p7 }
  0x33   : > { %987 = dma.hbm_to_vmem [thread:$0]  (!%p1358_p11), %s1566_s5, 1024, %s287_s22, [#allocation6], %s1253_s26, %s1253_s26, %s1254_s27  }
  0x34   : > { %p1144_p2 = pnand %p1143_p4, %p1137_p1 }
  0x36   : > { %1147 = shalt.err (!%p1144_p2)
}
  0x37   : > { %s1567_s7 = sld [smem:[#allocation18_spill]]  ;;  %s1389_s22 = sadd.s32 1, %s1248_s12  }
  0x38   : > { %s31_s28 = ssub.s32 %s1248_s12, %s1389_s22  ;;  %s34_s20 = sadd.s32 1, %s1244_s11 }
  0x39   : > { %p32_p4 = scmp.eq.s32.totalorder %s31_s28, 0  ;;  %p41_p6 = scmp.ne.s32.totalorder %s1244_s11, %s1240_s10 }
  0x3a   : > { %p42_p12 = scmp.eq.s32.totalorder %s1248_s12, 0  ;;  %p1002_p0 = scmp.lt.s32.totalorder %s1248_s12, 2 }
  0x3b   : > { %s1399_s29 = scalar_select %p32_p4, %s1244_s11, %s34_s20  }
  0x3c   : > { %p43_p5 = por %p42_p12, %p41_p6  ;;  %p1569_p3 = scmp.eq.s32.totalorder %s1330_s13, 1 }
  0x3d   : > { %990 = dma.hbm_to_vmem [thread:$0]  (!%p1358_p11), %s1567_s7, 1024, %s303_s24, [#allocation9], %s1253_s26, %s1253_s26, %s1254_s27  }
  0x3e   : > { %1568 = sst [smem:[#allocation15_spill]] %s1399_s29  ;;  %p1403_p10 = por %p1569_p3, %p41_p6 }
  0x3f   : > { %s319_s18 = sand.u32 1, %s1244_s11   ;;  %s861_s21 = sshll.u32 %s1248_s12, 7 }
  0x40   : > { %s1570_s14 = scalar_select %p1403_p10, 1, 0 }
  0x41   : > { %s860_s24 = sshll.u32 %s319_s18, 3  ;;  %s1412_s19 = scalar_lea.hbm %s1544_s0, %s861_s21 }
  0x42   : > { %s323_s23 = scalar_lea.vmem [#allocation2], %s860_s24  ;;  %p1414_p11 = pnand %p1002_p0, %p43_p5 }
  0x43   : > { %s330_s25 = sshll.u32 %s323_s23, 4  ;;  %s320_s20 = scalar_lea.sflag [#allocation3], %s319_s18  ;;  %s331_s25 = int_to_ptr.vmem [resolvable:$true] %s330_s25 }
  0x44   : > { %s1148_s3 = scalar_lea.hbm %s1412_s19, 128  ;;  %p1150_p1 = pneg %p1414_p11 }
  0x45   : > { %p1149_p7 = scmp.ne.s32.totalorder %s1412_s19, %s1148_s3  ;;  %s1153_s27 = scalar_lea.hbm %s1544_s0, 256 }
  0x46   : > { %p1154_p2 = scmp.lt.s32.totalorder %s1412_s19, %s1544_s0  ;;  %p1155_p4 = scmp.lt.s32.totalorder %s1153_s27, %s1148_s3 }
  0x47   : > { %p1151_p9 = pnand %p1150_p1, %p1149_p7 }
  0x48   : > { %p1156_p6 = por %p1155_p4, %p1154_p2 }
  0x49   : > { %p1152_p13 = pneg %p1151_p9 }
  0x4b   : > { %p1157_p12 = pnand %p1156_p6, %p1152_p13 }
  0x4d   : > { %1160 = shalt.err (!%p1157_p12)
}
  0x4e   : > { %s1161_s23 = scalar_lea.vmem %s331_s25, 128  ;;  %s1255_s18 = smov [#allocation2]  }
  0x4f   : > { %p1162_p0 = scmp.ne.s32.totalorder %s331_s25, %s1161_s23  ;;  %s1166_s7 = sshll.u32 %s1255_s18, 4  ;;  %s1167_s7 = int_to_ptr.vmem [resolvable:$false] %s1166_s7 }
  0x50   : > { %s1168_s29 = scalar_lea.vmem %s1167_s7, 256  ;;  %p1169_p7 = scmp.lt.s32.totalorder %s331_s25, %s1167_s7 }
  0x51   : > { %p1164_p5 = pnand %p1162_p0, %p1150_p1  ;;  %p1170_p9 = scmp.lt.s32.totalorder %s1168_s29, %s1161_s23 }
  0x53   : > { %p1165_p3 = pneg %p1164_p5  ;;  %p1171_p10 = por %p1170_p9, %p1169_p7 }
  0x55   : > { %p1172_p8 = pnand %p1171_p10, %p1165_p3 }
  0x57   : > { %1175 = shalt.err (!%p1172_p8)
}
  0x58   : > { %994 = dma.hbm_to_vmem [thread:$0]  (!%p1414_p11), %s1412_s19, 128, %s331_s25, %s320_s20  }
  0x59   : > { %p1572_p13 = scmp.ne.s32.totalorder %s1563_s17, 0 }
  0x5a   : > { %s1435_s3 = sand.u32 (!%p1572_p13), 1, %s1240_s10   ;;  %p1573_p10 = scmp.ne.s32.totalorder (!%p1572_p13), %s1561_s15, 0 }
  0x5b   : > { %339 = sbr.rel (%p1572_p13) target bundleno = 942 (0x3ae), region = 56  ;;  %s863_s5 = sshll.u32 (!%p1572_p13), %s1435_s3, 3 }
  0x5c   : > { %s342_s7 = scalar_lea.sflag (!%p1572_p13), [#allocation3], %s1435_s3  ;;  %s345_s29 = scalar_lea.vmem (!%p1572_p13), [#allocation2], %s863_s5 }
  0x60   : > { %1219 = dma.done.wait (%p1573_p10), %s342_s7, 128  }
  0x61   : > { %1221 = vsyncadd (%p1573_p10), %s342_s7, 4294967168  ;;  %p1574_p8 = scmp.eq.s32.totalorder %s1330_s13, 0 }
  0x63   : > { %1223 = dma.done.wait (%p1574_p8), [#allocation6], 1280   ;;  %p1575_p11 = pmov %p1574_p8 }
  0x64   : > { %p1576_p1 = pmov %p1574_p8 }
  0x65   : > { %1225 = vsyncadd (%p1575_p11), [#allocation6], 4294966016 }
  0x66   : > { %1227 = dma.done.wait (%p1576_p1), [#allocation9], 1024   ;;  %p1577_p2 = pmov %p1576_p1 }
  0x67   : > { %vm398_vm0 = vcmask 261120   ;;  %v397_v0 = vld [vmem:[%s345_s29] sm:$0xff]  ;;  %v1046_v4 = vld [vmem:[#allocation5 + $0x8] sm:$0xff]   ;;  %v1256_v5 = vmov 0.0   ;;  %vm1257_vm1 = vmmov 0   ;;  %v1047_v6 = vld [vmem:[#allocation5] sm:$0xff]  }
  0x68   : > { %1229 = vsyncadd (%p1577_p2), [#allocation9], 4294966272  ;;  %v399_v1 = vsel %vm398_vm0, %v397_v0, 0.0  ;;  %v402_v2 = vmul.f32 %v397_v0, %v397_v0  ;;  %917 = vmatprep.subr.bf16.mxu0 %v1256_v5  ;;  %921 = vmatprep.mubr.msk.bf16.mxu0 %vm1257_vm1, %v1256_v5  ;;  %v868_v17 = vld [vmem:[%s1545_s1] ss:$0 sm:$0xff]  ;;  %v1048_v23 = vld [vmem:[#allocation7 + $0x38] sm:$0xff]  }
  0x69   : > { %400 = vadd.xlane.f32.xlu0 %v399_v1  ;;  %918 = vmatpush3.bf16.msra.mxu0 %v1046_v4  ;;  %v869_v19 = vld [vmem:[%s1546_s2] ss:$0 sm:$0xff]  ;;  %v1049_v24 = vld [vmem:[#allocation7 + $0x30] sm:$0xff]   ;;  %v1050_v25 = vld [vmem:[#allocation7 + $0x28] sm:$0xff]   ;;  %s893_s23 = sshll.u32 %s1330_s13, 7  ;;  %s391_s18 = scalar_lea.vmem [#allocation10], %s863_s5 }
  0x6a   : > { %v403_v3 = vsel %vm398_vm0, %v402_v2, 0.0  ;;  %925 = vmatprep.subr.bf16.mxu1 %v1256_v5  ;;  %919 = vmatprep.subr.bf16.mxu0 %v1256_v5  ;;  %v1051_v26 = vld [vmem:[#allocation7 + $0x20] sm:$0xff]   ;;  %v1052_v27 = vld [vmem:[#allocation7 + $0x18] sm:$0xff]   ;;  %v1053_v28 = vld [vmem:[#allocation7 + $0x10] sm:$0xff]   ;;  %s755_s7 = sshll.u32 %s391_s18, 4  ;;  %s1501_s17 = scalar_lea.hbm %s1553_s9, %s893_s23  ;;  %s1503_s7 = int_to_ptr.vmem [resolvable:$true] %s755_s7 }
  0x6b   : > { %941 = vmatprep.mubr.msk.bf16.mxu1 %vm1257_vm1, %v1256_v5  ;;  %926 = vmatpush3.bf16.msra.mxu1 %v1048_v23  ;;  %v1054_v29 = vld [vmem:[#allocation7 + $0x8] sm:$0xff]   ;;  %v1055_v30 = vld [vmem:[#allocation7] sm:$0xff]   ;;  %v1056_v47 = vld [vmem:[#allocation8 + $0x38] sm:$0xff]   ;;  %s742_s19 = scalar_lea.sflag [#allocation4], %s1435_s3  ;;  %s1176_s13 = scalar_lea.vmem %s1503_s7, 128 }
  0x6c   : > { %927 = vmatprep.subr.bf16.mxu1 %v1256_v5  ;;  %v870_v31 = vld [vmem:[%s1548_s4] ss:$0 sm:$0xff]  ;;  %v1057_v48 = vld [vmem:[#allocation8 + $0x30] sm:$0xff]   ;;  %v1058_v49 = vld [vmem:[#allocation8 + $0x28] sm:$0xff]   ;;  %p1177_p4 = scmp.ne.s32.totalorder %s1503_s7, %s1176_s13  ;;  %p1578_p6 = scmp.ne.s32.totalorder %s1570_s14, 0 }
  0x6d   : > { %404 = vadd.xlane.f32.xlu0 %v403_v3  ;;  %920 = vmatpush3.bf16.msra.mxu0 %v1047_v6  ;;  %v1059_v50 = vld [vmem:[#allocation8 + $0x20] sm:$0xff]   ;;  %v1060_v51 = vld [vmem:[#allocation8 + $0x18] sm:$0xff]   ;;  %v1061_v52 = vld [vmem:[#allocation8 + $0x10] sm:$0xff]   ;;  %s1258_s5 = smov [#allocation10]  }
  0x6e   : > { %945 = vmatprep.subr.bf16.mxu0 %v1256_v5  ;;  %v1062_v53 = vld [vmem:[#allocation8 + $0x8] sm:$0xff]   ;;  %v1063_v54 = vld [vmem:[#allocation8] sm:$0xff]   ;;  %p1178_p12 = pnand %p1177_p4, %p1578_p6  ;;  %s1180_s25 = sshll.u32 %s1258_s5, 4  ;;  %s1181_s25 = int_to_ptr.vmem [resolvable:$false] %s1180_s25 }
  0x6f   : > { %928 = vmatpush3.bf16.msra.mxu1 %v1049_v24  ;;  %v874_v55 = vld [vmem:[%s1550_s6] ss:$0 sm:$0xff]  ;;  %s1182_s28 = scalar_lea.vmem %s1181_s25, 256  ;;  %p1183_p5 = scmp.lt.s32.totalorder %s1503_s7, %s1181_s25 }
  0x70   : > { %929 = vmatprep.subr.bf16.mxu1 %v1256_v5  ;;  %p1179_p0 = pneg %p1178_p12  ;;  %p1184_p3 = scmp.lt.s32.totalorder %s1182_s28, %s1176_s13 }
  0x72   : > { %p1185_p7 = por %p1184_p3, %p1183_p5 }
  0x73   : > { %930 = vmatpush3.bf16.msra.mxu1 %v1050_v25 }
  0x74   : > { %931 = vmatprep.subr.bf16.mxu1 %v1256_v5  ;;  %p1186_p9 = pnand %p1185_p7, %p1179_p0 }
  0x77   : > { %932 = vmatpush3.bf16.msra.mxu1 %v1051_v26 }
  0x78   : > { %933 = vmatprep.subr.bf16.mxu1 %v1256_v5 }
  0x7b   : > { %934 = vmatpush3.bf16.msra.mxu1 %v1052_v27 }
  0x7c   : > { %935 = vmatprep.subr.bf16.mxu1 %v1256_v5 }
  0x7f   : > { %936 = vmatpush3.bf16.msra.mxu1 %v1053_v28 }
  0x80   : > { %937 = vmatprep.subr.bf16.mxu1 %v1256_v5 }
  0x83   : > { %938 = vmatpush3.bf16.msra.mxu1 %v1054_v29 }
  0x84   : > { %939 = vmatprep.subr.bf16.mxu1 %v1256_v5 }
  0x87   : > { %940 = vmatpush3.bf16.msra.mxu1 %v1055_v30 }
  0xf2   : > { %v401_v7 = vpop.xlane.xlu0 %400 }
  0xf3   : > { %v406_v8 = vmul.f32 0.03125, %v401_v7  ;;  %v883_v7 = vld [vmem:[%s1552_s8] ss:$0 sm:$0xff] }
  0xf5   : > { %v408_v10 = vmul.f32 %v406_v8, %v406_v8  ;;  %v411_v15 = vsub.f32 %v397_v0, %v406_v8 }
  0xf6   : > { %v405_v9 = vpop.xlane.xlu0 %404 }
  0xf7   : > { %v407_v11 = vmul.f32 0.03125, %v405_v9 }
  0xf9   : > { %v409_v12 = vsub.f32 %v407_v11, %v408_v10 }
  0xfb   : > { %v410_v13 = vmax.f32 %v409_v12, 0.0 }
  0xfd   : > { %v412_v14 = vadd.f32 1e-05, %v410_v13 }
  0xff   : > { %1064 = vrsqrt.f32 %v412_v14 }
 0x10c   : > { %v1065_v16 = vpop.eup %1064 }
 0x10d   : > { %v414_v18 = vmul.f32 %v1065_v16, %v411_v15 }
 0x10f   : > { %v422_v20 = vmul.f32 %v868_v17, %v414_v18 }
 0x111   : > { %v430_v21 = vadd.f32 %v869_v19, %v422_v20 }
 0x113   : > { %v431_v22 = vpack.c.bf16 %v430_v21, %v430_v21 }
 0x115   : > { %922 = vmatmul.mubr.msk.bf16.vlgmr.msra.gmra.mxu0 %vm398_vm0, %v431_v22 }
 0x116   : > { %961 = vmatprep.mubr.msk.bf16.mxu0 %vm1257_vm1, %v1256_v5  ;;  %946 = vmatpush3.bf16.msra.mxu0 %v1056_v47 }
 0x117   : > { %947 = vmatprep.subr.bf16.mxu0 %v1256_v5 }
 0x11a   : > { %948 = vmatpush3.bf16.msra.mxu0 %v1057_v48 }
 0x11b   : > { %949 = vmatprep.subr.bf16.mxu0 %v1256_v5 }
 0x11e   : > { %950 = vmatpush3.bf16.msra.mxu0 %v1058_v49 }
 0x11f   : > { %951 = vmatprep.subr.bf16.mxu0 %v1256_v5 }
 0x122   : > { %952 = vmatpush3.bf16.msra.mxu0 %v1059_v50 }
 0x123   : > { %953 = vmatprep.subr.bf16.mxu0 %v1256_v5 }
 0x126   : > { %954 = vmatpush3.bf16.msra.mxu0 %v1060_v51 }
 0x127   : > { %955 = vmatprep.subr.bf16.mxu0 %v1256_v5 }
 0x12a   : > { %956 = vmatpush3.bf16.msra.mxu0 %v1061_v52 }
 0x12b   : > { %957 = vmatprep.subr.bf16.mxu0 %v1256_v5 }
 0x12e   : > { %958 = vmatpush3.bf16.msra.mxu0 %v1062_v53 }
 0x12f   : > { %959 = vmatprep.subr.bf16.mxu0 %v1256_v5 }
 0x132   : > { %960 = vmatpush3.bf16.msra.mxu0 %v1063_v54 }
 0x1d5   : > { %v492_v32 = vpop.f32.mrf.mxu0 }
 0x1d6   : > { %v493_v33 = vadd.f32 %v870_v31, %v492_v32 }
 0x1d7   : > { %v923_v34 = vpop.f32.mrf.mxu0 }
 0x1d8   : > { %v498_v35 = vpack.c.bf16 %v493_v33, %v493_v33 }
 0x1d9   : > { %v495_v36 = vpop.f32.mrf.mxu0 }
 0x1da   : > { %v499_v37 = vmul.bf16 %v498_v35, %v498_v35 }
 0x1db   : > { %v924_v38 = vpop.f32.mrf.mxu0 }
 0x1dc   : > { %v500_v39 = vmul.bf16 %v499_v37, %v498_v35 }
 0x1de   : > { %v501_v40 = vmul.bf16 1027030327, %v500_v39 }
 0x1e0   : > { %v502_v41 = vadd.bf16 %v501_v40, %v498_v35 }
 0x1e2   : > { %v503_v42 = vmul.bf16 1061961548, %v502_v41 }
 0x1e4   : > { %1066 = vtanh.bf16 %v503_v42 }
 0x1f2   : > { %v1067_v43 = vpop.eup %1066 }
 0x1f3   : > { %v505_v44 = vadd.bf16 1065369472, %v1067_v43 }
 0x1f5   : > { %v506_v45 = vmul.bf16 1056980736, %v505_v44 }
 0x1f7   : > { %v507_v46 = vmul.bf16 %v506_v45, %v498_v35 }
 0x1f9   : > { %942 = vmatmul.mubr.bf16.vlgmr.msra.gmra.mxu1 %v507_v46 }
 0x2b9   : > { %v613_v56 = vpop.f32.mrf.mxu1 }
 0x2ba   : > { %v614_v57 = vadd.f32 %v874_v55, %v613_v56 }
 0x2bb   : > { %v943_v58 = vpop.f32.mrf.mxu1 }
 0x2bc   : > { %v619_v59 = vpack.c.bf16 %v614_v57, %v614_v57 }
 0x2bd   : > { %v616_v60 = vpop.f32.mrf.mxu1 }
 0x2be   : > { %v620_v61 = vmul.bf16 %v619_v59, %v619_v59 }
 0x2bf   : > { %v944_v62 = vpop.f32.mrf.mxu1 }
 0x2c0   : > { %v621_v63 = vmul.bf16 %v620_v61, %v619_v59 }
 0x2c2   : > { %v622_v0 = vmul.bf16 1027030327, %v621_v63 }
 0x2c4   : > { %v623_v1 = vadd.bf16 %v622_v0, %v619_v59 }
 0x2c6   : > { %v624_v2 = vmul.bf16 1061961548, %v623_v1 }
 0x2c8   : > { %1068 = vtanh.bf16 %v624_v2 }
 0x2d6   : > { %v1069_v3 = vpop.eup %1068 }
 0x2d7   : > { %v626_v4 = vadd.bf16 1065369472, %v1069_v3 }
 0x2d9   : > { %v627_v5 = vmul.bf16 1056980736, %v626_v4 }
 0x2db   : > { %v628_v6 = vmul.bf16 %v627_v5, %v619_v59 }
 0x2dd   : > { %962 = vmatmul.mubr.bf16.vlgmr.msra.gmra.mxu0 %v628_v6 }
 0x39d   : > { %v734_v8 = vpop.f32.mrf.mxu0 }
 0x39e   : > { %v735_v9 = vadd.f32 %v883_v7, %v734_v8 }
 0x39f   : > { %v963_v10 = vpop.f32.mrf.mxu0 }
 0x3a0   : > { %740 = vst [vmem:[%s391_s18] sm:$0xff] %v735_v9 }
 0x3a1   : > { %v737_v11 = vpop.f32.mrf.mxu0 }
 0x3a2   : > { %1189 = shalt.err (!%p1186_p9)
}
 0x3a3   : > { %s1190_s20 = scalar_lea.hbm %s1501_s17, 128  ;;  %s1194_s26 = scalar_lea.hbm %s1553_s9, 256 }
 0x3a4   : > { %p1191_p13 = scmp.ne.s32.totalorder %s1501_s17, %s1190_s20  ;;  %p1195_p11 = scmp.lt.s32.totalorder %s1501_s17, %s1553_s9 }
 0x3a5   : > { %p1196_p1 = scmp.lt.s32.totalorder %s1194_s26, %s1190_s20 }
 0x3a6   : > { %p1192_p10 = pnand %p1191_p13, %p1578_p6 }
 0x3a7   : > { %p1197_p2 = por %p1196_p1, %p1195_p11 }
 0x3a8   : > { %p1193_p8 = pneg %p1192_p10 }
 0x3aa   : > { %p1198_p4 = pnand %p1197_p2, %p1193_p8 }
 0x3ac   : > { %1201 = shalt.err (!%p1198_p4)
}
 0x3ad   : > { %979 = dma.vmem_to_hbm [thread:$0]  (%p1578_p6), %s1503_s7, 128, %s1501_s17, %s742_s19   ;;  %v964_v12 = vpop.f32.mrf.mxu0 }
 0x3ae PF: > { %s767_s23 = sand.u32 1, %s1236_s30   ;;  %p1579_p12 = scmp.ne.s32.totalorder %s1562_s16, 0 }
 0x3af   : > { %p1580_p0 = scmp.ge.s32.totalorder %s1248_s12, 2  ;;  %s768_s18 = scalar_lea.sflag [#allocation4], %s767_s23 }
 0x3b1   : > { %p996_p5 = pnand %p1580_p0, %p1579_p12 }
 0x3b3   : > { %p997_p3 = pneg %p996_p5 }
 0x3b5   : > { %1231 = dma.done.wait (%p997_p3), %s768_s18, 128  }
 0x3b6   : > { %1233 = vsyncadd (%p997_p3), %s768_s18, 4294967168  ;;  %s1581_s14 = sld [smem:[#allocation15_spill]]  ;;  %p24_p7 = scmp.ge.s32.totalorder %s1389_s22, 4  }
 0x3b7   : > { %s1582_s30 = smov %s1240_s10  ;;  %s1583_s10 = smov %s1244_s11 }
 0x3b8   : > { %s1585_s12 = smov %s1389_s22  ;;  %26 = sbr.rel (!%p24_p7) target bundleno = 11 (0xb), region = 113 }
 0x3bc   : > { %s1584_s11 = smov %s1581_s14 }
 0x3bd   :  { %773 = vsyncpa [#allocation3], 1 }
 0x3be   :  { %775 = vsyncpa [#allocation3 + $0x1], 1 }
 0x3bf   :  { %776 = vsyncpa [#allocation6], 1 }
 0x3c0   :  { %777 = vsyncpa [#allocation9], 1 }
 0x3c1   :  { %778 = vsyncpa [#allocation4], 1 }
 0x3c2   :  { %780 = vsyncpa [#allocation4 + $0x1], 1 }

</bundles_post_ra>
